<compile_context>
chip_gen: v5e
topology: v5e:2x2
jax: 0.10.0
libtpu: 0.0.40
codegen_flags: <defaults>
</compile_context>

<pallas_src>
import functools

import numpy as np
import jax
import jax.numpy as jnp
from jax import lax
from jax.experimental import pallas as pl
from jax.experimental.pallas import tpu as pltpu


def _sigmoid(z):
    # sigmoid(z) == 0.5 * (tanh(z/2) + 1): tanh lowers to the EUP (free bundle
    # slot) instead of a VALU divide chain.
    return 0.5 * (jnp.tanh(0.5 * z) + 1.0)


def _round_up(x, m):
    return ((x + m - 1) // m) * m


def _pick_time_chunk(t, b_pad, gate_dim):
    """Time-chunk TT: ~1 MiB of f32 gates per chunk, clamped to [8, 32], <= T."""
    bytes_per_step = max(b_pad * gate_dim * 4, 1)
    tt = (1 << 20) // bytes_per_step
    tt = int(min(32, max(8, tt)))
    return max(1, min(tt, t))


# ----------------------------------------------------------------------------
# Fused kernel: input projection + LSTM recurrence + LayerNorm + residual
# ----------------------------------------------------------------------------
def _fused_lstm_kernel(x_ref, wih_ref, whh_ref, b_ref, gamma_ref, beta_ref,
                       o_ref, xg_scr, h_scr, c_scr, *,
                       tt, b, d, h, add_residual, eps):
    # New batch slice starts: reset the h/c carries.
    @pl.when(pl.program_id(1) == 0)
    def _():
        h_scr[...] = jnp.zeros_like(h_scr)
        c_scr[...] = jnp.zeros_like(c_scr)

    wih = wih_ref[...]                      # (D, 4H)   resident
    whh = whh_ref[...]                      # (H, 4H)   resident
    gamma = gamma_ref[...]                  # (1, H)
    beta = beta_ref[...]                    # (1, H)

    # 1) One big MXU matmul for the whole time chunk: (TT*B, D) @ (D, 4H).
    x_flat = x_ref[...].reshape(tt * b, d)
    xg = jnp.dot(x_flat.astype(wih.dtype), wih,
                 preferred_element_type=jnp.float32) + b_ref[...]
    xg_scr[...] = xg.reshape(tt, b, 4 * h)

    # 2) Sequential recurrence over the TT steps of this chunk (unrolled).
    def step(i, carry):
        h_prev, c_prev = carry
        gates = xg_scr[i] + jnp.dot(h_prev.astype(whh.dtype), whh,
                                    preferred_element_type=jnp.float32)
        i_g = _sigmoid(gates[:, 0 * h:1 * h])
        f_g = _sigmoid(gates[:, 1 * h:2 * h])
        g_g = jnp.tanh(gates[:, 2 * h:3 * h])
        o_g = _sigmoid(gates[:, 3 * h:4 * h])

        c_new = f_g * c_prev + i_g * g_g
        h_new = o_g * jnp.tanh(c_new)

        # Fused LayerNorm over the hidden axis (biased variance, torch eps).
        mean = jnp.mean(h_new, axis=-1, keepdims=True)
        cen = h_new - mean
        var = jnp.mean(cen * cen, axis=-1, keepdims=True)
        y = cen * lax.rsqrt(var + eps) * gamma + beta

        if add_residual:
            # Residual = the same input chunk already resident for the matmul.
            y = y + x_ref[i]

        o_ref[i] = y.astype(o_ref.dtype)
        return h_new, c_new

    h_fin, c_fin = lax.fori_loop(0, tt, step, (h_scr[...], c_scr[...]),
                                 unroll=True)
    h_scr[...] = h_fin
    c_scr[...] = c_fin


def _fused_layer(x_tbd, w_ihT, w_hhT, bias_row, gamma_row, beta_row, *,
                 hidden, add_residual, eps, time_chunk, batch_split):
    tp, bp, d = x_tbd.shape
    h = hidden
    g = 4 * h
    n_tc = tp // time_chunk
    bph = bp // batch_split

    kernel = functools.partial(_fused_lstm_kernel, tt=time_chunk, b=bph,
                               d=d, h=h, add_residual=add_residual, eps=eps)

    # Advisory cost estimate for XLA's scheduler.
    cost = pl.CostEstimate(
        flops=int(2 * tp * bp * d * g + 2 * tp * bp * h * g),
        transcendentals=int(tp * bp * 5 * h),
        bytes_accessed=int(x_tbd.size * x_tbd.dtype.itemsize
                           + tp * bp * h * 4
                           + (w_ihT.size + w_hhT.size) * w_ihT.dtype.itemsize
                           + (g + 2 * h) * 4))

    # Explicit VMEM budget (double-buffered chunks + resident weights + scratch).
    wbytes = w_ihT.dtype.itemsize
    vmem_needed = (2 * (d * g + h * g) * wbytes
                   + 2 * time_chunk * bph * (d + h) * 4
                   + time_chunk * bph * g * 4
                   + 2 * bph * h * 4
                   + (g + 2 * h) * 4)
    vmem_limit = int(min(64 << 20, max(32 << 20, 2 * vmem_needed)))

    out = pl.pallas_call(
        kernel,
        out_shape=jax.ShapeDtypeStruct((tp, bp, h), jnp.float32),
        grid_spec=pltpu.PrefetchScalarGridSpec(
            num_scalar_prefetch=0,
            grid=(batch_split, n_tc),
            in_specs=[
                pl.BlockSpec((time_chunk, bph, d), lambda bi, ti: (ti, bi, 0)),
                pl.BlockSpec((d, g), lambda bi, ti: (0, 0)),   # W_ih^T resident
                pl.BlockSpec((h, g), lambda bi, ti: (0, 0)),   # W_hh^T resident
                pl.BlockSpec((1, g), lambda bi, ti: (0, 0)),   # bias
                pl.BlockSpec((1, h), lambda bi, ti: (0, 0)),   # gamma
                pl.BlockSpec((1, h), lambda bi, ti: (0, 0)),   # beta
            ],
            out_specs=pl.BlockSpec((time_chunk, bph, h),
                                   lambda bi, ti: (ti, bi, 0)),
            scratch_shapes=[
                pltpu.VMEM((time_chunk, bph, g), jnp.float32),  # gate buffer
                pltpu.VMEM((bph, h), jnp.float32),              # h carry
                pltpu.VMEM((bph, h), jnp.float32),              # c carry
            ],
        ),
        compiler_params=pltpu.CompilerParams(
            dimension_semantics=("parallel", "arbitrary"),
            vmem_limit_bytes=vmem_limit),
        cost_estimate=cost,
    )(x_tbd, w_ihT, w_hhT, bias_row, gamma_row, beta_row)
    return out


def residual_lstm_forward(x, params, *, time_chunk=None,
                          mxu_dtype=jnp.float32):
    """Pallas implementation of ResidualLSTM.forward (inference)."""
    b, t, d0 = x.shape
    h = params[0]["w_hhT"].shape[0]
    g = 4 * h

    bp = _round_up(max(b, 1), 8)                       # sublane-pad batch
    tt = time_chunk or _pick_time_chunk(t, bp, g)
    tp = _round_up(t, tt)                              # pad time to chunks
    # v7x: split the batch over the 2 TensorCores when each half stays
    # sublane-aligned; harmless no-op on single-TC chips.
    batch_split = 2 if (bp % 16 == 0 and bp >= 16) else 1

    x_tbd = jnp.transpose(x, (1, 0, 2))                # (T, B, D) once at entry
    x_tbd = jnp.pad(x_tbd, ((0, tp - t), (0, bp - b), (0, 0)))

    out = x_tbd
    for p in params:
        d = out.shape[-1]
        out = _fused_layer(out,
                           p["w_ihT"].astype(mxu_dtype),
                           p["w_hhT"].astype(mxu_dtype),
                           p["bias"], p["gamma"], p["beta"],
                           hidden=h, add_residual=(d == h), eps=1e-5,
                           time_chunk=tt, batch_split=batch_split)
        # TODO(synk): nn.Dropout between layers is a no-op at inference.

    out = out[:t, :b, :]
    return jnp.transpose(out, (1, 0, 2))               # (B, T, H) once at exit


# ----------------------------------------------------------------------------
# Parameters (mirroring the PyTorch init scheme) and pure-JAX reference
# ----------------------------------------------------------------------------
def init_params(key, input_size, hidden_size, num_layers):
    params = []
    glorot = jax.nn.initializers.glorot_uniform()
    orth = jax.nn.initializers.orthogonal()
    for i in range(num_layers):
        d = input_size if i == 0 else hidden_size
        key, k1, k2 = jax.random.split(key, 3)
        w_ih = glorot(k1, (4 * hidden_size, d), jnp.float32)
        w_hh = orth(k2, (4 * hidden_size, hidden_size), jnp.float32)
        b_ih = jnp.zeros((4 * hidden_size,), jnp.float32)
        b_ih = b_ih.at[hidden_size:2 * hidden_size].set(1.0)   # forget-gate bias
        b_hh = jnp.zeros((4 * hidden_size,), jnp.float32)
        b_hh = b_hh.at[hidden_size:2 * hidden_size].set(1.0)
        gamma = jnp.ones((hidden_size,), jnp.float32)
        beta = jnp.zeros((hidden_size,), jnp.float32)
        params.append(dict(
            w_ih=w_ih, w_hh=w_hh, b_ih=b_ih, b_hh=b_hh,
            gamma_vec=gamma, beta_vec=beta,
            # kernel-friendly layouts
            w_ihT=w_ih.T, w_hhT=w_hh.T,
            bias=(b_ih + b_hh).reshape(1, 4 * hidden_size),
            gamma=gamma.reshape(1, hidden_size),
            beta=beta.reshape(1, hidden_size)))
    return params


def _reference(x, params, eps=1e-5):
    out = x
    for p in params:
        w_ih, w_hh = p["w_ih"], p["w_hh"]
        bias = p["b_ih"] + p["b_hh"]
        h_dim = w_hh.shape[1]
        bsz = out.shape[0]

        def step(carry, x_t, w_ih=w_ih, w_hh=w_hh, bias=bias, h_dim=h_dim):
            hh, cc = carry
            gates = x_t @ w_ih.T + hh @ w_hh.T + bias
            i = jax.nn.sigmoid(gates[:, :h_dim])
            f = jax.nn.sigmoid(gates[:, h_dim:2 * h_dim])
            g = jnp.tanh(gates[:, 2 * h_dim:3 * h_dim])
            o = jax.nn.sigmoid(gates[:, 3 * h_dim:4 * h_dim])
            cc = f * cc + i * g
            hh = o * jnp.tanh(cc)
            return (hh, cc), hh

        h0 = jnp.zeros((bsz, h_dim), jnp.float32)
        c0 = jnp.zeros((bsz, h_dim), jnp.float32)
        xs = jnp.transpose(out, (1, 0, 2))
        _, hs = lax.scan(step, (h0, c0), xs)
        lstm_out = jnp.transpose(hs, (1, 0, 2))
        mean = jnp.mean(lstm_out, -1, keepdims=True)
        var = jnp.mean((lstm_out - mean) ** 2, -1, keepdims=True)
        ln = ((lstm_out - mean) * lax.rsqrt(var + eps)
              * p["gamma_vec"] + p["beta_vec"])
        if out.shape[-1] == h_dim:
            ln = ln + out
        out = ln
    return out


if __name__ == "__main__":
    key = jax.random.PRNGKey(0)
    batch, seq, input_size, hidden_size, num_layers = 2, 8, 32, 32, 2

    k_x, k_p = jax.random.split(key)
    x = jax.random.normal(k_x, (batch, seq, input_size), dtype=jnp.float32)
    params = init_params(k_p, input_size, hidden_size, num_layers)

    ref = jax.block_until_ready(_reference(x, params))

    # f32 MXU path (bit-faithful to the PyTorch forward)
    out = jax.block_until_ready(residual_lstm_forward(x, params))
    assert out.shape == (batch, seq, hidden_size) and out.dtype == jnp.float32
    np.testing.assert_allclose(np.asarray(out), np.asarray(ref),
                               rtol=2e-3, atol=2e-3)

    # bf16 MXU-operand path (v6e/v7x fast path; f32 accumulation & LN math)
    out_bf16 = jax.block_until_ready(
        residual_lstm_forward(x, params, mxu_dtype=jnp.bfloat16))
    np.testing.assert_allclose(np.asarray(out_bf16), np.asarray(ref),
                               rtol=1e-1, atol=1e-1)

    print("KERNEL_OK")
</pallas_src>

<mosaic_0001>
module attributes {stable_mosaic.version = 11 : i64} {
  func.func @_fused_lstm_kernel(%arg0: i32, %arg1: i32, %arg2: memref<8x8x32xf32, #tpu.memory_space<vmem>>, %arg3: memref<32x128xf32, #tpu.memory_space<vmem>>, %arg4: memref<32x128xf32, #tpu.memory_space<vmem>>, %arg5: memref<1x128xf32, #tpu.memory_space<vmem>>, %arg6: memref<1x32xf32, #tpu.memory_space<vmem>>, %arg7: memref<1x32xf32, #tpu.memory_space<vmem>>, %arg8: memref<8x8x32xf32, #tpu.memory_space<vmem>>, %arg9: memref<8x8x128xf32, #tpu.memory_space<vmem>>, %arg10: memref<8x32xf32, #tpu.memory_space<vmem>>, %arg11: memref<8x32xf32, #tpu.memory_space<vmem>>) attributes {dimension_semantics = [#tpu.dimension_semantics<parallel>, #tpu.dimension_semantics<arbitrary>], iteration_bounds = array<i64: 1, 1>, scalar_prefetch = 0 : i64, scratch_operands = 3 : i64, tpu.core_type = #tpu.core_type<tc>, window_params = [{transform_indices = @transform_0, window_bounds = array<i64: 8, 8, 32>}, {pipeline_mode = #tpu.pipeline_mode<synchronous>, transform_indices = @transform_1, window_bounds = array<i64: 32, 128>}, {pipeline_mode = #tpu.pipeline_mode<synchronous>, transform_indices = @transform_2, window_bounds = array<i64: 32, 128>}, {pipeline_mode = #tpu.pipeline_mode<synchronous>, transform_indices = @transform_3, window_bounds = array<i64: 1, 128>}, {pipeline_mode = #tpu.pipeline_mode<synchronous>, transform_indices = @transform_4, window_bounds = array<i64: 1, 32>}, {pipeline_mode = #tpu.pipeline_mode<synchronous>, transform_indices = @transform_5, window_bounds = array<i64: 1, 32>}, {transform_indices = @transform_6, window_bounds = array<i64: 8, 8, 32>}]} {
    %c0_i32 = arith.constant 0 : i32
    %0 = arith.cmpi eq, %arg1, %c0_i32 : i32
    %1 = arith.extui %0 : i1 to i32
    %c0_i32_0 = arith.constant 0 : i32
    %2 = arith.cmpi ne, %1, %c0_i32_0 : i32
    scf.if %2 {
      %cst_193 = arith.constant 0.000000e+00 : f32
      %531 = vector.broadcast %cst_193 : f32 to vector<8x32xf32>
      %c0_194 = arith.constant 0 : index
      %c0_195 = arith.constant 0 : index
      %532 = vector.load %arg10[%c0_194, %c0_195] : memref<8x32xf32, #tpu.memory_space<vmem>>, vector<8x32xf32>
      tpu.vector_store %arg10[%c0_194, %c0_195], %531 {strides = array<i32>} : memref<8x32xf32, #tpu.memory_space<vmem>>, vector<8x32xf32>,
      %cst_196 = arith.constant 0.000000e+00 : f32
      %533 = vector.broadcast %cst_196 : f32 to vector<8x32xf32>
      %c0_197 = arith.constant 0 : index
      %c0_198 = arith.constant 0 : index
      %534 = vector.load %arg11[%c0_197, %c0_198] : memref<8x32xf32, #tpu.memory_space<vmem>>, vector<8x32xf32>
      tpu.vector_store %arg11[%c0_197, %c0_198], %533 {strides = array<i32>} : memref<8x32xf32, #tpu.memory_space<vmem>>, vector<8x32xf32>,
    } else {
    }
    %c0 = arith.constant 0 : index
    %c0_1 = arith.constant 0 : index
    %3 = vector.load %arg3[%c0, %c0_1] : memref<32x128xf32, #tpu.memory_space<vmem>>, vector<32x128xf32>
    %c0_2 = arith.constant 0 : index
    %c0_3 = arith.constant 0 : index
    %4 = vector.load %arg4[%c0_2, %c0_3] : memref<32x128xf32, #tpu.memory_space<vmem>>, vector<32x128xf32>
    %c0_4 = arith.constant 0 : index
    %c0_5 = arith.constant 0 : index
    %5 = vector.load %arg6[%c0_4, %c0_5] : memref<1x32xf32, #tpu.memory_space<vmem>>, vector<1x32xf32>
    %c0_6 = arith.constant 0 : index
    %c0_7 = arith.constant 0 : index
    %6 = vector.load %arg7[%c0_6, %c0_7] : memref<1x32xf32, #tpu.memory_space<vmem>>, vector<1x32xf32>
    %c0_8 = arith.constant 0 : index
    %c0_9 = arith.constant 0 : index
    %c0_10 = arith.constant 0 : index
    %7 = vector.load %arg2[%c0_8, %c0_9, %c0_10] : memref<8x8x32xf32, #tpu.memory_space<vmem>>, vector<8x8x32xf32>
    %8 = vector.shape_cast %7 : vector<8x8x32xf32> to vector<64x32xf32>
    %cst = arith.constant dense<0.000000e+00> : vector<64x128xf32>
    %9 = tpu.matmul %8, %3, %cst {dimension_numbers = #tpu.dot_dimension_numbers<[1], [0], [0], [1], [0, 0, 1, 1], [], []>} : vector<64x32xf32>, vector<32x128xf32>, vector<64x128xf32> -> vector<64x128xf32>
    %c0_11 = arith.constant 0 : index
    %c0_12 = arith.constant 0 : index
    %10 = vector.load %arg5[%c0_11, %c0_12] : memref<1x128xf32, #tpu.memory_space<vmem>>, vector<1x128xf32>
    %11 = vector.broadcast %10 : vector<1x128xf32> to vector<64x128xf32>
    %12 = arith.addf %9, %11 : vector<64x128xf32>
    %13 = vector.shape_cast %12 : vector<64x128xf32> to vector<8x8x128xf32>
    %c0_13 = arith.constant 0 : index
    %c0_14 = arith.constant 0 : index
    %c0_15 = arith.constant 0 : index
    %14 = vector.load %arg9[%c0_13, %c0_14, %c0_15] : memref<8x8x128xf32, #tpu.memory_space<vmem>>, vector<8x8x128xf32>
    tpu.vector_store %arg9[%c0_13, %c0_14, %c0_15], %13 {strides = array<i32>} : memref<8x8x128xf32, #tpu.memory_space<vmem>>, vector<8x8x128xf32>,
    %c0_16 = arith.constant 0 : index
    %c0_17 = arith.constant 0 : index
    %15 = vector.load %arg10[%c0_16, %c0_17] : memref<8x32xf32, #tpu.memory_space<vmem>>, vector<8x32xf32>
    %c0_18 = arith.constant 0 : index
    %c0_19 = arith.constant 0 : index
    %16 = vector.load %arg11[%c0_18, %c0_19] : memref<8x32xf32, #tpu.memory_space<vmem>>, vector<8x32xf32>
    %c0_i32_20 = arith.constant 0 : i32
    %17 = arith.index_cast %c0_i32_20 : i32 to index
    %c0_21 = arith.constant 0 : index
    %c0_22 = arith.constant 0 : index
    %18 = vector.load %arg9[%17, %c0_21, %c0_22] : memref<8x8x128xf32, #tpu.memory_space<vmem>>, vector<1x8x128xf32>
    %19 = vector.shape_cast %18 : vector<1x8x128xf32> to vector<8x128xf32>
    %cst_23 = arith.constant dense<0.000000e+00> : vector<8x128xf32>
    %20 = tpu.matmul %15, %4, %cst_23 {dimension_numbers = #tpu.dot_dimension_numbers<[1], [0], [0], [1], [0, 0, 1, 1], [], []>} : vector<8x32xf32>, vector<32x128xf32>, vector<8x128xf32> -> vector<8x128xf32>
    %21 = arith.addf %19, %20 : vector<8x128xf32>
    %22 = vector.extract_strided_slice %21 {offsets = [0, 0], sizes = [8, 32], strides = [1, 1]} : vector<8x128xf32> to vector<8x32xf32>
    %cst_24 = arith.constant 5.000000e-01 : f32
    %23 = vector.broadcast %cst_24 : f32 to vector<8x32xf32>
    %24 = arith.mulf %23, %22 : vector<8x32xf32>
    %25 = math.tanh %24 : vector<8x32xf32>
    %cst_25 = arith.constant 1.000000e+00 : f32
    %26 = vector.broadcast %cst_25 : f32 to vector<8x32xf32>
    %27 = arith.addf %25, %26 : vector<8x32xf32>
    %cst_26 = arith.constant 5.000000e-01 : f32
    %28 = vector.broadcast %cst_26 : f32 to vector<8x32xf32>
    %29 = arith.mulf %28, %27 : vector<8x32xf32>
    %30 = vector.extract_strided_slice %21 {offsets = [0, 32], sizes = [8, 32], strides = [1, 1]} : vector<8x128xf32> to vector<8x32xf32>
    %cst_27 = arith.constant 5.000000e-01 : f32
    %31 = vector.broadcast %cst_27 : f32 to vector<8x32xf32>
    %32 = arith.mulf %31, %30 : vector<8x32xf32>
    %33 = math.tanh %32 : vector<8x32xf32>
    %cst_28 = arith.constant 1.000000e+00 : f32
    %34 = vector.broadcast %cst_28 : f32 to vector<8x32xf32>
    %35 = arith.addf %33, %34 : vector<8x32xf32>
    %cst_29 = arith.constant 5.000000e-01 : f32
    %36 = vector.broadcast %cst_29 : f32 to vector<8x32xf32>
    %37 = arith.mulf %36, %35 : vector<8x32xf32>
    %38 = vector.extract_strided_slice %21 {offsets = [0, 64], sizes = [8, 32], strides = [1, 1]} : vector<8x128xf32> to vector<8x32xf32>
    %39 = math.tanh %38 : vector<8x32xf32>
    %40 = vector.extract_strided_slice %21 {offsets = [0, 96], sizes = [8, 32], strides = [1, 1]} : vector<8x128xf32> to vector<8x32xf32>
    %cst_30 = arith.constant 5.000000e-01 : f32
    %41 = vector.broadcast %cst_30 : f32 to vector<8x32xf32>
    %42 = arith.mulf %41, %40 : vector<8x32xf32>
    %43 = math.tanh %42 : vector<8x32xf32>
    %cst_31 = arith.constant 1.000000e+00 : f32
    %44 = vector.broadcast %cst_31 : f32 to vector<8x32xf32>
    %45 = arith.addf %43, %44 : vector<8x32xf32>
    %cst_32 = arith.constant 5.000000e-01 : f32
    %46 = vector.broadcast %cst_32 : f32 to vector<8x32xf32>
    %47 = arith.mulf %46, %45 : vector<8x32xf32>
    %48 = arith.mulf %37, %16 : vector<8x32xf32>
    %49 = arith.mulf %29, %39 : vector<8x32xf32>
    %50 = arith.addf %48, %49 : vector<8x32xf32>
    %51 = math.tanh %50 : vector<8x32xf32>
    %52 = arith.mulf %47, %51 : vector<8x32xf32>
    %cst_33 = arith.constant dense<0.000000e+00> : vector<8xf32>
    %53 = vector.multi_reduction <add>, %52, %cst_33 [1] : vector<8x32xf32> to vector<8xf32>
    %54 = vector.shape_cast %53 : vector<8xf32> to vector<8x1xf32>
    %cst_34 = arith.constant 3.200000e+01 : f32
    %55 = vector.broadcast %cst_34 : f32 to vector<8x1xf32>
    %56 = arith.divf %54, %55 : vector<8x1xf32>
    %57 = vector.broadcast %56 : vector<8x1xf32> to vector<8x32xf32>
    %58 = arith.subf %52, %57 : vector<8x32xf32>
    %59 = arith.mulf %58, %58 : vector<8x32xf32>
    %cst_35 = arith.constant dense<0.000000e+00> : vector<8xf32>
    %60 = vector.multi_reduction <add>, %59, %cst_35 [1] : vector<8x32xf32> to vector<8xf32>
    %61 = vector.shape_cast %60 : vector<8xf32> to vector<8x1xf32>
    %cst_36 = arith.constant 3.200000e+01 : f32
    %62 = vector.broadcast %cst_36 : f32 to vector<8x1xf32>
    %63 = arith.divf %61, %62 : vector<8x1xf32>
    %cst_37 = arith.constant 9.99999974E-6 : f32
    %64 = vector.broadcast %cst_37 : f32 to vector<8x1xf32>
    %65 = arith.addf %63, %64 : vector<8x1xf32>
    %66 = math.rsqrt %65 : vector<8x1xf32>
    %67 = vector.broadcast %66 : vector<8x1xf32> to vector<8x32xf32>
    %68 = arith.mulf %58, %67 : vector<8x32xf32>
    %69 = vector.broadcast %5 : vector<1x32xf32> to vector<8x32xf32>
    %70 = arith.mulf %68, %69 : vector<8x32xf32>
    %71 = vector.broadcast %6 : vector<1x32xf32> to vector<8x32xf32>
    %72 = arith.addf %70, %71 : vector<8x32xf32>
    %73 = arith.index_cast %c0_i32_20 : i32 to index
    %c0_38 = arith.constant 0 : index
    %c0_39 = arith.constant 0 : index
    %74 = vector.load %arg2[%73, %c0_38, %c0_39] : memref<8x8x32xf32, #tpu.memory_space<vmem>>, vector<1x8x32xf32>
    %75 = vector.shape_cast %74 : vector<1x8x32xf32> to vector<8x32xf32>
    %76 = arith.addf %72, %75 : vector<8x32xf32>
    %77 = arith.index_cast %c0_i32_20 : i32 to index
    %c0_40 = arith.constant 0 : index
    %c0_41 = arith.constant 0 : index
    %78 = vector.load %arg8[%77, %c0_40, %c0_41] : memref<8x8x32xf32, #tpu.memory_space<vmem>>, vector<1x8x32xf32>
    %79 = vector.shape_cast %78 : vector<1x8x32xf32> to vector<8x32xf32>
    %80 = vector.shape_cast %76 : vector<8x32xf32> to vector<1x8x32xf32>
    tpu.vector_store %arg8[%77, %c0_40, %c0_41], %80 {strides = array<i32>} : memref<8x8x32xf32, #tpu.memory_space<vmem>>, vector<1x8x32xf32>,
    %c1_i32 = arith.constant 1 : i32
    %81 = arith.index_cast %c1_i32 : i32 to index
    %c0_42 = arith.constant 0 : index
    %c0_43 = arith.constant 0 : index
    %82 = vector.load %arg9[%81, %c0_42, %c0_43] : memref<8x8x128xf32, #tpu.memory_space<vmem>>, vector<1x8x128xf32>
    %83 = vector.shape_cast %82 : vector<1x8x128xf32> to vector<8x128xf32>
    %cst_44 = arith.constant dense<0.000000e+00> : vector<8x128xf32>
    %84 = tpu.matmul %52, %4, %cst_44 {dimension_numbers = #tpu.dot_dimension_numbers<[1], [0], [0], [1], [0, 0, 1, 1], [], []>} : vector<8x32xf32>, vector<32x128xf32>, vector<8x128xf32> -> vector<8x128xf32>
    %85 = arith.addf %83, %84 : vector<8x128xf32>
    %86 = vector.extract_strided_slice %85 {offsets = [0, 0], sizes = [8, 32], strides = [1, 1]} : vector<8x128xf32> to vector<8x32xf32>
    %cst_45 = arith.constant 5.000000e-01 : f32
    %87 = vector.broadcast %cst_45 : f32 to vector<8x32xf32>
    %88 = arith.mulf %87, %86 : vector<8x32xf32>
    %89 = math.tanh %88 : vector<8x32xf32>
    %cst_46 = arith.constant 1.000000e+00 : f32
    %90 = vector.broadcast %cst_46 : f32 to vector<8x32xf32>
    %91 = arith.addf %89, %90 : vector<8x32xf32>
    %cst_47 = arith.constant 5.000000e-01 : f32
    %92 = vector.broadcast %cst_47 : f32 to vector<8x32xf32>
    %93 = arith.mulf %92, %91 : vector<8x32xf32>
    %94 = vector.extract_strided_slice %85 {offsets = [0, 32], sizes = [8, 32], strides = [1, 1]} : vector<8x128xf32> to vector<8x32xf32>
    %cst_48 = arith.constant 5.000000e-01 : f32
    %95 = vector.broadcast %cst_48 : f32 to vector<8x32xf32>
    %96 = arith.mulf %95, %94 : vector<8x32xf32>
    %97 = math.tanh %96 : vector<8x32xf32>
    %cst_49 = arith.constant 1.000000e+00 : f32
    %98 = vector.broadcast %cst_49 : f32 to vector<8x32xf32>
    %99 = arith.addf %97, %98 : vector<8x32xf32>
    %cst_50 = arith.constant 5.000000e-01 : f32
    %100 = vector.broadcast %cst_50 : f32 to vector<8x32xf32>
    %101 = arith.mulf %100, %99 : vector<8x32xf32>
    %102 = vector.extract_strided_slice %85 {offsets = [0, 64], sizes = [8, 32], strides = [1, 1]} : vector<8x128xf32> to vector<8x32xf32>
    %103 = math.tanh %102 : vector<8x32xf32>
    %104 = vector.extract_strided_slice %85 {offsets = [0, 96], sizes = [8, 32], strides = [1, 1]} : vector<8x128xf32> to vector<8x32xf32>
    %cst_51 = arith.constant 5.000000e-01 : f32
    %105 = vector.broadcast %cst_51 : f32 to vector<8x32xf32>
    %106 = arith.mulf %105, %104 : vector<8x32xf32>
    %107 = math.tanh %106 : vector<8x32xf32>
    %cst_52 = arith.constant 1.000000e+00 : f32
    %108 = vector.broadcast %cst_52 : f32 to vector<8x32xf32>
    %109 = arith.addf %107, %108 : vector<8x32xf32>
    %cst_53 = arith.constant 5.000000e-01 : f32
    %110 = vector.broadcast %cst_53 : f32 to vector<8x32xf32>
    %111 = arith.mulf %110, %109 : vector<8x32xf32>
    %112 = arith.mulf %101, %50 : vector<8x32xf32>
    %113 = arith.mulf %93, %103 : vector<8x32xf32>
    %114 = arith.addf %112, %113 : vector<8x32xf32>
    %115 = math.tanh %114 : vector<8x32xf32>
    %116 = arith.mulf %111, %115 : vector<8x32xf32>
    %cst_54 = arith.constant dense<0.000000e+00> : vector<8xf32>
    %117 = vector.multi_reduction <add>, %116, %cst_54 [1] : vector<8x32xf32> to vector<8xf32>
    %118 = vector.shape_cast %117 : vector<8xf32> to vector<8x1xf32>
    %cst_55 = arith.constant 3.200000e+01 : f32
    %119 = vector.broadcast %cst_55 : f32 to vector<8x1xf32>
    %120 = arith.divf %118, %119 : vector<8x1xf32>
    %121 = vector.broadcast %120 : vector<8x1xf32> to vector<8x32xf32>
    %122 = arith.subf %116, %121 : vector<8x32xf32>
    %123 = arith.mulf %122, %122 : vector<8x32xf32>
    %cst_56 = arith.constant dense<0.000000e+00> : vector<8xf32>
    %124 = vector.multi_reduction <add>, %123, %cst_56 [1] : vector<8x32xf32> to vector<8xf32>
    %125 = vector.shape_cast %124 : vector<8xf32> to vector<8x1xf32>
    %cst_57 = arith.constant 3.200000e+01 : f32
    %126 = vector.broadcast %cst_57 : f32 to vector<8x1xf32>
    %127 = arith.divf %125, %126 : vector<8x1xf32>
    %cst_58 = arith.constant 9.99999974E-6 : f32
    %128 = vector.broadcast %cst_58 : f32 to vector<8x1xf32>
    %129 = arith.addf %127, %128 : vector<8x1xf32>
    %130 = math.rsqrt %129 : vector<8x1xf32>
    %131 = vector.broadcast %130 : vector<8x1xf32> to vector<8x32xf32>
    %132 = arith.mulf %122, %131 : vector<8x32xf32>
    %133 = vector.broadcast %5 : vector<1x32xf32> to vector<8x32xf32>
    %134 = arith.mulf %132, %133 : vector<8x32xf32>
    %135 = vector.broadcast %6 : vector<1x32xf32> to vector<8x32xf32>
    %136 = arith.addf %134, %135 : vector<8x32xf32>
    %137 = arith.index_cast %c1_i32 : i32 to index
    %c0_59 = arith.constant 0 : index
    %c0_60 = arith.constant 0 : index
    %138 = vector.load %arg2[%137, %c0_59, %c0_60] : memref<8x8x32xf32, #tpu.memory_space<vmem>>, vector<1x8x32xf32>
    %139 = vector.shape_cast %138 : vector<1x8x32xf32> to vector<8x32xf32>
    %140 = arith.addf %136, %139 : vector<8x32xf32>
    %141 = arith.index_cast %c1_i32 : i32 to index
    %c0_61 = arith.constant 0 : index
    %c0_62 = arith.constant 0 : index
    %142 = vector.load %arg8[%141, %c0_61, %c0_62] : memref<8x8x32xf32, #tpu.memory_space<vmem>>, vector<1x8x32xf32>
    %143 = vector.shape_cast %142 : vector<1x8x32xf32> to vector<8x32xf32>
    %144 = vector.shape_cast %140 : vector<8x32xf32> to vector<1x8x32xf32>
    tpu.vector_store %arg8[%141, %c0_61, %c0_62], %144 {strides = array<i32>} : memref<8x8x32xf32, #tpu.memory_space<vmem>>, vector<1x8x32xf32>,
    %c2_i32 = arith.constant 2 : i32
    %145 = arith.index_cast %c2_i32 : i32 to index
    %c0_63 = arith.constant 0 : index
    %c0_64 = arith.constant 0 : index
    %146 = vector.load %arg9[%145, %c0_63, %c0_64] : memref<8x8x128xf32, #tpu.memory_space<vmem>>, vector<1x8x128xf32>
    %147 = vector.shape_cast %146 : vector<1x8x128xf32> to vector<8x128xf32>
    %cst_65 = arith.constant dense<0.000000e+00> : vector<8x128xf32>
    %148 = tpu.matmul %116, %4, %cst_65 {dimension_numbers = #tpu.dot_dimension_numbers<[1], [0], [0], [1], [0, 0, 1, 1], [], []>} : vector<8x32xf32>, vector<32x128xf32>, vector<8x128xf32> -> vector<8x128xf32>
    %149 = arith.addf %147, %148 : vector<8x128xf32>
    %150 = vector.extract_strided_slice %149 {offsets = [0, 0], sizes = [8, 32], strides = [1, 1]} : vector<8x128xf32> to vector<8x32xf32>
    %cst_66 = arith.constant 5.000000e-01 : f32
    %151 = vector.broadcast %cst_66 : f32 to vector<8x32xf32>
    %152 = arith.mulf %151, %150 : vector<8x32xf32>
    %153 = math.tanh %152 : vector<8x32xf32>
    %cst_67 = arith.constant 1.000000e+00 : f32
    %154 = vector.broadcast %cst_67 : f32 to vector<8x32xf32>
    %155 = arith.addf %153, %154 : vector<8x32xf32>
    %cst_68 = arith.constant 5.000000e-01 : f32
    %156 = vector.broadcast %cst_68 : f32 to vector<8x32xf32>
    %157 = arith.mulf %156, %155 : vector<8x32xf32>
    %158 = vector.extract_strided_slice %149 {offsets = [0, 32], sizes = [8, 32], strides = [1, 1]} : vector<8x128xf32> to vector<8x32xf32>
    %cst_69 = arith.constant 5.000000e-01 : f32
    %159 = vector.broadcast %cst_69 : f32 to vector<8x32xf32>
    %160 = arith.mulf %159, %158 : vector<8x32xf32>
    %161 = math.tanh %160 : vector<8x32xf32>
    %cst_70 = arith.constant 1.000000e+00 : f32
    %162 = vector.broadcast %cst_70 : f32 to vector<8x32xf32>
    %163 = arith.addf %161, %162 : vector<8x32xf32>
    %cst_71 = arith.constant 5.000000e-01 : f32
    %164 = vector.broadcast %cst_71 : f32 to vector<8x32xf32>
    %165 = arith.mulf %164, %163 : vector<8x32xf32>
    %166 = vector.extract_strided_slice %149 {offsets = [0, 64], sizes = [8, 32], strides = [1, 1]} : vector<8x128xf32> to vector<8x32xf32>
    %167 = math.tanh %166 : vector<8x32xf32>
    %168 = vector.extract_strided_slice %149 {offsets = [0, 96], sizes = [8, 32], strides = [1, 1]} : vector<8x128xf32> to vector<8x32xf32>
    %cst_72 = arith.constant 5.000000e-01 : f32
    %169 = vector.broadcast %cst_72 : f32 to vector<8x32xf32>
    %170 = arith.mulf %169, %168 : vector<8x32xf32>
    %171 = math.tanh %170 : vector<8x32xf32>
    %cst_73 = arith.constant 1.000000e+00 : f32
    %172 = vector.broadcast %cst_73 : f32 to vector<8x32xf32>
    %173 = arith.addf %171, %172 : vector<8x32xf32>
    %cst_74 = arith.constant 5.000000e-01 : f32
    %174 = vector.broadcast %cst_74 : f32 to vector<8x32xf32>
    %175 = arith.mulf %174, %173 : vector<8x32xf32>
    %176 = arith.mulf %165, %114 : vector<8x32xf32>
    %177 = arith.mulf %157, %167 : vector<8x32xf32>
    %178 = arith.addf %176, %177 : vector<8x32xf32>
    %179 = math.tanh %178 : vector<8x32xf32>
    %180 = arith.mulf %175, %179 : vector<8x32xf32>
    %cst_75 = arith.constant dense<0.000000e+00> : vector<8xf32>
    %181 = vector.multi_reduction <add>, %180, %cst_75 [1] : vector<8x32xf32> to vector<8xf32>
    %182 = vector.shape_cast %181 : vector<8xf32> to vector<8x1xf32>
    %cst_76 = arith.constant 3.200000e+01 : f32
    %183 = vector.broadcast %cst_76 : f32 to vector<8x1xf32>
    %184 = arith.divf %182, %183 : vector<8x1xf32>
    %185 = vector.broadcast %184 : vector<8x1xf32> to vector<8x32xf32>
    %186 = arith.subf %180, %185 : vector<8x32xf32>
    %187 = arith.mulf %186, %186 : vector<8x32xf32>
    %cst_77 = arith.constant dense<0.000000e+00> : vector<8xf32>
    %188 = vector.multi_reduction <add>, %187, %cst_77 [1] : vector<8x32xf32> to vector<8xf32>
    %189 = vector.shape_cast %188 : vector<8xf32> to vector<8x1xf32>
    %cst_78 = arith.constant 3.200000e+01 : f32
    %190 = vector.broadcast %cst_78 : f32 to vector<8x1xf32>
    %191 = arith.divf %189, %190 : vector<8x1xf32>
    %cst_79 = arith.constant 9.99999974E-6 : f32
    %192 = vector.broadcast %cst_79 : f32 to vector<8x1xf32>
    %193 = arith.addf %191, %192 : vector<8x1xf32>
    %194 = math.rsqrt %193 : vector<8x1xf32>
    %195 = vector.broadcast %194 : vector<8x1xf32> to vector<8x32xf32>
    %196 = arith.mulf %186, %195 : vector<8x32xf32>
    %197 = vector.broadcast %5 : vector<1x32xf32> to vector<8x32xf32>
    %198 = arith.mulf %196, %197 : vector<8x32xf32>
    %199 = vector.broadcast %6 : vector<1x32xf32> to vector<8x32xf32>
    %200 = arith.addf %198, %199 : vector<8x32xf32>
    %201 = arith.index_cast %c2_i32 : i32 to index
    %c0_80 = arith.constant 0 : index
    %c0_81 = arith.constant 0 : index
    %202 = vector.load %arg2[%201, %c0_80, %c0_81] : memref<8x8x32xf32, #tpu.memory_space<vmem>>, vector<1x8x32xf32>
    %203 = vector.shape_cast %202 : vector<1x8x32xf32> to vector<8x32xf32>
    %204 = arith.addf %200, %203 : vector<8x32xf32>
    %205 = arith.index_cast %c2_i32 : i32 to index
    %c0_82 = arith.constant 0 : index
    %c0_83 = arith.constant 0 : index
    %206 = vector.load %arg8[%205, %c0_82, %c0_83] : memref<8x8x32xf32, #tpu.memory_space<vmem>>, vector<1x8x32xf32>
    %207 = vector.shape_cast %206 : vector<1x8x32xf32> to vector<8x32xf32>
    %208 = vector.shape_cast %204 : vector<8x32xf32> to vector<1x8x32xf32>
    tpu.vector_store %arg8[%205, %c0_82, %c0_83], %208 {strides = array<i32>} : memref<8x8x32xf32, #tpu.memory_space<vmem>>, vector<1x8x32xf32>,
    %c3_i32 = arith.constant 3 : i32
    %209 = arith.index_cast %c3_i32 : i32 to index
    %c0_84 = arith.constant 0 : index
    %c0_85 = arith.constant 0 : index
    %210 = vector.load %arg9[%209, %c0_84, %c0_85] : memref<8x8x128xf32, #tpu.memory_space<vmem>>, vector<1x8x128xf32>
    %211 = vector.shape_cast %210 : vector<1x8x128xf32> to vector<8x128xf32>
    %cst_86 = arith.constant dense<0.000000e+00> : vector<8x128xf32>
    %212 = tpu.matmul %180, %4, %cst_86 {dimension_numbers = #tpu.dot_dimension_numbers<[1], [0], [0], [1], [0, 0, 1, 1], [], []>} : vector<8x32xf32>, vector<32x128xf32>, vector<8x128xf32> -> vector<8x128xf32>
    %213 = arith.addf %211, %212 : vector<8x128xf32>
    %214 = vector.extract_strided_slice %213 {offsets = [0, 0], sizes = [8, 32], strides = [1, 1]} : vector<8x128xf32> to vector<8x32xf32>
    %cst_87 = arith.constant 5.000000e-01 : f32
    %215 = vector.broadcast %cst_87 : f32 to vector<8x32xf32>
    %216 = arith.mulf %215, %214 : vector<8x32xf32>
    %217 = math.tanh %216 : vector<8x32xf32>
    %cst_88 = arith.constant 1.000000e+00 : f32
    %218 = vector.broadcast %cst_88 : f32 to vector<8x32xf32>
    %219 = arith.addf %217, %218 : vector<8x32xf32>
    %cst_89 = arith.constant 5.000000e-01 : f32
    %220 = vector.broadcast %cst_89 : f32 to vector<8x32xf32>
    %221 = arith.mulf %220, %219 : vector<8x32xf32>
    %222 = vector.extract_strided_slice %213 {offsets = [0, 32], sizes = [8, 32], strides = [1, 1]} : vector<8x128xf32> to vector<8x32xf32>
    %cst_90 = arith.constant 5.000000e-01 : f32
    %223 = vector.broadcast %cst_90 : f32 to vector<8x32xf32>
    %224 = arith.mulf %223, %222 : vector<8x32xf32>
    %225 = math.tanh %224 : vector<8x32xf32>
    %cst_91 = arith.constant 1.000000e+00 : f32
    %226 = vector.broadcast %cst_91 : f32 to vector<8x32xf32>
    %227 = arith.addf %225, %226 : vector<8x32xf32>
    %cst_92 = arith.constant 5.000000e-01 : f32
    %228 = vector.broadcast %cst_92 : f32 to vector<8x32xf32>
    %229 = arith.mulf %228, %227 : vector<8x32xf32>
    %230 = vector.extract_strided_slice %213 {offsets = [0, 64], sizes = [8, 32], strides = [1, 1]} : vector<8x128xf32> to vector<8x32xf32>
    %231 = math.tanh %230 : vector<8x32xf32>
    %232 = vector.extract_strided_slice %213 {offsets = [0, 96], sizes = [8, 32], strides = [1, 1]} : vector<8x128xf32> to vector<8x32xf32>
    %cst_93 = arith.constant 5.000000e-01 : f32
    %233 = vector.broadcast %cst_93 : f32 to vector<8x32xf32>
    %234 = arith.mulf %233, %232 : vector<8x32xf32>
    %235 = math.tanh %234 : vector<8x32xf32>
    %cst_94 = arith.constant 1.000000e+00 : f32
    %236 = vector.broadcast %cst_94 : f32 to vector<8x32xf32>
    %237 = arith.addf %235, %236 : vector<8x32xf32>
    %cst_95 = arith.constant 5.000000e-01 : f32
    %238 = vector.broadcast %cst_95 : f32 to vector<8x32xf32>
    %239 = arith.mulf %238, %237 : vector<8x32xf32>
    %240 = arith.mulf %229, %178 : vector<8x32xf32>
    %241 = arith.mulf %221, %231 : vector<8x32xf32>
    %242 = arith.addf %240, %241 : vector<8x32xf32>
    %243 = math.tanh %242 : vector<8x32xf32>
    %244 = arith.mulf %239, %243 : vector<8x32xf32>
    %cst_96 = arith.constant dense<0.000000e+00> : vector<8xf32>
    %245 = vector.multi_reduction <add>, %244, %cst_96 [1] : vector<8x32xf32> to vector<8xf32>
    %246 = vector.shape_cast %245 : vector<8xf32> to vector<8x1xf32>
    %cst_97 = arith.constant 3.200000e+01 : f32
    %247 = vector.broadcast %cst_97 : f32 to vector<8x1xf32>
    %248 = arith.divf %246, %247 : vector<8x1xf32>
    %249 = vector.broadcast %248 : vector<8x1xf32> to vector<8x32xf32>
    %250 = arith.subf %244, %249 : vector<8x32xf32>
    %251 = arith.mulf %250, %250 : vector<8x32xf32>
    %cst_98 = arith.constant dense<0.000000e+00> : vector<8xf32>
    %252 = vector.multi_reduction <add>, %251, %cst_98 [1] : vector<8x32xf32> to vector<8xf32>
    %253 = vector.shape_cast %252 : vector<8xf32> to vector<8x1xf32>
    %cst_99 = arith.constant 3.200000e+01 : f32
    %254 = vector.broadcast %cst_99 : f32 to vector<8x1xf32>
    %255 = arith.divf %253, %254 : vector<8x1xf32>
    %cst_100 = arith.constant 9.99999974E-6 : f32
    %256 = vector.broadcast %cst_100 : f32 to vector<8x1xf32>
    %257 = arith.addf %255, %256 : vector<8x1xf32>
    %258 = math.rsqrt %257 : vector<8x1xf32>
    %259 = vector.broadcast %258 : vector<8x1xf32> to vector<8x32xf32>
    %260 = arith.mulf %250, %259 : vector<8x32xf32>
    %261 = vector.broadcast %5 : vector<1x32xf32> to vector<8x32xf32>
    %262 = arith.mulf %260, %261 : vector<8x32xf32>
    %263 = vector.broadcast %6 : vector<1x32xf32> to vector<8x32xf32>
    %264 = arith.addf %262, %263 : vector<8x32xf32>
    %265 = arith.index_cast %c3_i32 : i32 to index
    %c0_101 = arith.constant 0 : index
    %c0_102 = arith.constant 0 : index
    %266 = vector.load %arg2[%265, %c0_101, %c0_102] : memref<8x8x32xf32, #tpu.memory_space<vmem>>, vector<1x8x32xf32>
    %267 = vector.shape_cast %266 : vector<1x8x32xf32> to vector<8x32xf32>
    %268 = arith.addf %264, %267 : vector<8x32xf32>
    %269 = arith.index_cast %c3_i32 : i32 to index
    %c0_103 = arith.constant 0 : index
    %c0_104 = arith.constant 0 : index
    %270 = vector.load %arg8[%269, %c0_103, %c0_104] : memref<8x8x32xf32, #tpu.memory_space<vmem>>, vector<1x8x32xf32>
    %271 = vector.shape_cast %270 : vector<1x8x32xf32> to vector<8x32xf32>
    %272 = vector.shape_cast %268 : vector<8x32xf32> to vector<1x8x32xf32>
    tpu.vector_store %arg8[%269, %c0_103, %c0_104], %272 {strides = array<i32>} : memref<8x8x32xf32, #tpu.memory_space<vmem>>, vector<1x8x32xf32>,
    %c4_i32 = arith.constant 4 : i32
    %273 = arith.index_cast %c4_i32 : i32 to index
    %c0_105 = arith.constant 0 : index
    %c0_106 = arith.constant 0 : index
    %274 = vector.load %arg9[%273, %c0_105, %c0_106] : memref<8x8x128xf32, #tpu.memory_space<vmem>>, vector<1x8x128xf32>
    %275 = vector.shape_cast %274 : vector<1x8x128xf32> to vector<8x128xf32>
    %cst_107 = arith.constant dense<0.000000e+00> : vector<8x128xf32>
    %276 = tpu.matmul %244, %4, %cst_107 {dimension_numbers = #tpu.dot_dimension_numbers<[1], [0], [0], [1], [0, 0, 1, 1], [], []>} : vector<8x32xf32>, vector<32x128xf32>, vector<8x128xf32> -> vector<8x128xf32>
    %277 = arith.addf %275, %276 : vector<8x128xf32>
    %278 = vector.extract_strided_slice %277 {offsets = [0, 0], sizes = [8, 32], strides = [1, 1]} : vector<8x128xf32> to vector<8x32xf32>
    %cst_108 = arith.constant 5.000000e-01 : f32
    %279 = vector.broadcast %cst_108 : f32 to vector<8x32xf32>
    %280 = arith.mulf %279, %278 : vector<8x32xf32>
    %281 = math.tanh %280 : vector<8x32xf32>
    %cst_109 = arith.constant 1.000000e+00 : f32
    %282 = vector.broadcast %cst_109 : f32 to vector<8x32xf32>
    %283 = arith.addf %281, %282 : vector<8x32xf32>
    %cst_110 = arith.constant 5.000000e-01 : f32
    %284 = vector.broadcast %cst_110 : f32 to vector<8x32xf32>
    %285 = arith.mulf %284, %283 : vector<8x32xf32>
    %286 = vector.extract_strided_slice %277 {offsets = [0, 32], sizes = [8, 32], strides = [1, 1]} : vector<8x128xf32> to vector<8x32xf32>
    %cst_111 = arith.constant 5.000000e-01 : f32
    %287 = vector.broadcast %cst_111 : f32 to vector<8x32xf32>
    %288 = arith.mulf %287, %286 : vector<8x32xf32>
    %289 = math.tanh %288 : vector<8x32xf32>
    %cst_112 = arith.constant 1.000000e+00 : f32
    %290 = vector.broadcast %cst_112 : f32 to vector<8x32xf32>
    %291 = arith.addf %289, %290 : vector<8x32xf32>
    %cst_113 = arith.constant 5.000000e-01 : f32
    %292 = vector.broadcast %cst_113 : f32 to vector<8x32xf32>
    %293 = arith.mulf %292, %291 : vector<8x32xf32>
    %294 = vector.extract_strided_slice %277 {offsets = [0, 64], sizes = [8, 32], strides = [1, 1]} : vector<8x128xf32> to vector<8x32xf32>
    %295 = math.tanh %294 : vector<8x32xf32>
    %296 = vector.extract_strided_slice %277 {offsets = [0, 96], sizes = [8, 32], strides = [1, 1]} : vector<8x128xf32> to vector<8x32xf32>
    %cst_114 = arith.constant 5.000000e-01 : f32
    %297 = vector.broadcast %cst_114 : f32 to vector<8x32xf32>
    %298 = arith.mulf %297, %296 : vector<8x32xf32>
    %299 = math.tanh %298 : vector<8x32xf32>
    %cst_115 = arith.constant 1.000000e+00 : f32
    %300 = vector.broadcast %cst_115 : f32 to vector<8x32xf32>
    %301 = arith.addf %299, %300 : vector<8x32xf32>
    %cst_116 = arith.constant 5.000000e-01 : f32
    %302 = vector.broadcast %cst_116 : f32 to vector<8x32xf32>
    %303 = arith.mulf %302, %301 : vector<8x32xf32>
    %304 = arith.mulf %293, %242 : vector<8x32xf32>
    %305 = arith.mulf %285, %295 : vector<8x32xf32>
    %306 = arith.addf %304, %305 : vector<8x32xf32>
    %307 = math.tanh %306 : vector<8x32xf32>
    %308 = arith.mulf %303, %307 : vector<8x32xf32>
    %cst_117 = arith.constant dense<0.000000e+00> : vector<8xf32>
    %309 = vector.multi_reduction <add>, %308, %cst_117 [1] : vector<8x32xf32> to vector<8xf32>
    %310 = vector.shape_cast %309 : vector<8xf32> to vector<8x1xf32>
    %cst_118 = arith.constant 3.200000e+01 : f32
    %311 = vector.broadcast %cst_118 : f32 to vector<8x1xf32>
    %312 = arith.divf %310, %311 : vector<8x1xf32>
    %313 = vector.broadcast %312 : vector<8x1xf32> to vector<8x32xf32>
    %314 = arith.subf %308, %313 : vector<8x32xf32>
    %315 = arith.mulf %314, %314 : vector<8x32xf32>
    %cst_119 = arith.constant dense<0.000000e+00> : vector<8xf32>
    %316 = vector.multi_reduction <add>, %315, %cst_119 [1] : vector<8x32xf32> to vector<8xf32>
    %317 = vector.shape_cast %316 : vector<8xf32> to vector<8x1xf32>
    %cst_120 = arith.constant 3.200000e+01 : f32
    %318 = vector.broadcast %cst_120 : f32 to vector<8x1xf32>
    %319 = arith.divf %317, %318 : vector<8x1xf32>
    %cst_121 = arith.constant 9.99999974E-6 : f32
    %320 = vector.broadcast %cst_121 : f32 to vector<8x1xf32>
    %321 = arith.addf %319, %320 : vector<8x1xf32>
    %322 = math.rsqrt %321 : vector<8x1xf32>
    %323 = vector.broadcast %322 : vector<8x1xf32> to vector<8x32xf32>
    %324 = arith.mulf %314, %323 : vector<8x32xf32>
    %325 = vector.broadcast %5 : vector<1x32xf32> to vector<8x32xf32>
    %326 = arith.mulf %324, %325 : vector<8x32xf32>
    %327 = vector.broadcast %6 : vector<1x32xf32> to vector<8x32xf32>
    %328 = arith.addf %326, %327 : vector<8x32xf32>
    %329 = arith.index_cast %c4_i32 : i32 to index
    %c0_122 = arith.constant 0 : index
    %c0_123 = arith.constant 0 : index
    %330 = vector.load %arg2[%329, %c0_122, %c0_123] : memref<8x8x32xf32, #tpu.memory_space<vmem>>, vector<1x8x32xf32>
    %331 = vector.shape_cast %330 : vector<1x8x32xf32> to vector<8x32xf32>
    %332 = arith.addf %328, %331 : vector<8x32xf32>
    %333 = arith.index_cast %c4_i32 : i32 to index
    %c0_124 = arith.constant 0 : index
    %c0_125 = arith.constant 0 : index
    %334 = vector.load %arg8[%333, %c0_124, %c0_125] : memref<8x8x32xf32, #tpu.memory_space<vmem>>, vector<1x8x32xf32>
    %335 = vector.shape_cast %334 : vector<1x8x32xf32> to vector<8x32xf32>
    %336 = vector.shape_cast %332 : vector<8x32xf32> to vector<1x8x32xf32>
    tpu.vector_store %arg8[%333, %c0_124, %c0_125], %336 {strides = array<i32>} : memref<8x8x32xf32, #tpu.memory_space<vmem>>, vector<1x8x32xf32>,
    %c5_i32 = arith.constant 5 : i32
    %337 = arith.index_cast %c5_i32 : i32 to index
    %c0_126 = arith.constant 0 : index
    %c0_127 = arith.constant 0 : index
    %338 = vector.load %arg9[%337, %c0_126, %c0_127] : memref<8x8x128xf32, #tpu.memory_space<vmem>>, vector<1x8x128xf32>
    %339 = vector.shape_cast %338 : vector<1x8x128xf32> to vector<8x128xf32>
    %cst_128 = arith.constant dense<0.000000e+00> : vector<8x128xf32>
    %340 = tpu.matmul %308, %4, %cst_128 {dimension_numbers = #tpu.dot_dimension_numbers<[1], [0], [0], [1], [0, 0, 1, 1], [], []>} : vector<8x32xf32>, vector<32x128xf32>, vector<8x128xf32> -> vector<8x128xf32>
    %341 = arith.addf %339, %340 : vector<8x128xf32>
    %342 = vector.extract_strided_slice %341 {offsets = [0, 0], sizes = [8, 32], strides = [1, 1]} : vector<8x128xf32> to vector<8x32xf32>
    %cst_129 = arith.constant 5.000000e-01 : f32
    %343 = vector.broadcast %cst_129 : f32 to vector<8x32xf32>
    %344 = arith.mulf %343, %342 : vector<8x32xf32>
    %345 = math.tanh %344 : vector<8x32xf32>
    %cst_130 = arith.constant 1.000000e+00 : f32
    %346 = vector.broadcast %cst_130 : f32 to vector<8x32xf32>
    %347 = arith.addf %345, %346 : vector<8x32xf32>
    %cst_131 = arith.constant 5.000000e-01 : f32
    %348 = vector.broadcast %cst_131 : f32 to vector<8x32xf32>
    %349 = arith.mulf %348, %347 : vector<8x32xf32>
    %350 = vector.extract_strided_slice %341 {offsets = [0, 32], sizes = [8, 32], strides = [1, 1]} : vector<8x128xf32> to vector<8x32xf32>
    %cst_132 = arith.constant 5.000000e-01 : f32
    %351 = vector.broadcast %cst_132 : f32 to vector<8x32xf32>
    %352 = arith.mulf %351, %350 : vector<8x32xf32>
    %353 = math.tanh %352 : vector<8x32xf32>
    %cst_133 = arith.constant 1.000000e+00 : f32
    %354 = vector.broadcast %cst_133 : f32 to vector<8x32xf32>
    %355 = arith.addf %353, %354 : vector<8x32xf32>
    %cst_134 = arith.constant 5.000000e-01 : f32
    %356 = vector.broadcast %cst_134 : f32 to vector<8x32xf32>
    %357 = arith.mulf %356, %355 : vector<8x32xf32>
    %358 = vector.extract_strided_slice %341 {offsets = [0, 64], sizes = [8, 32], strides = [1, 1]} : vector<8x128xf32> to vector<8x32xf32>
    %359 = math.tanh %358 : vector<8x32xf32>
    %360 = vector.extract_strided_slice %341 {offsets = [0, 96], sizes = [8, 32], strides = [1, 1]} : vector<8x128xf32> to vector<8x32xf32>
    %cst_135 = arith.constant 5.000000e-01 : f32
    %361 = vector.broadcast %cst_135 : f32 to vector<8x32xf32>
    %362 = arith.mulf %361, %360 : vector<8x32xf32>
    %363 = math.tanh %362 : vector<8x32xf32>
    %cst_136 = arith.constant 1.000000e+00 : f32
    %364 = vector.broadcast %cst_136 : f32 to vector<8x32xf32>
    %365 = arith.addf %363, %364 : vector<8x32xf32>
    %cst_137 = arith.constant 5.000000e-01 : f32
    %366 = vector.broadcast %cst_137 : f32 to vector<8x32xf32>
    %367 = arith.mulf %366, %365 : vector<8x32xf32>
    %368 = arith.mulf %357, %306 : vector<8x32xf32>
    %369 = arith.mulf %349, %359 : vector<8x32xf32>
    %370 = arith.addf %368, %369 : vector<8x32xf32>
    %371 = math.tanh %370 : vector<8x32xf32>
    %372 = arith.mulf %367, %371 : vector<8x32xf32>
    %cst_138 = arith.constant dense<0.000000e+00> : vector<8xf32>
    %373 = vector.multi_reduction <add>, %372, %cst_138 [1] : vector<8x32xf32> to vector<8xf32>
    %374 = vector.shape_cast %373 : vector<8xf32> to vector<8x1xf32>
    %cst_139 = arith.constant 3.200000e+01 : f32
    %375 = vector.broadcast %cst_139 : f32 to vector<8x1xf32>
    %376 = arith.divf %374, %375 : vector<8x1xf32>
    %377 = vector.broadcast %376 : vector<8x1xf32> to vector<8x32xf32>
    %378 = arith.subf %372, %377 : vector<8x32xf32>
    %379 = arith.mulf %378, %378 : vector<8x32xf32>
    %cst_140 = arith.constant dense<0.000000e+00> : vector<8xf32>
    %380 = vector.multi_reduction <add>, %379, %cst_140 [1] : vector<8x32xf32> to vector<8xf32>
    %381 = vector.shape_cast %380 : vector<8xf32> to vector<8x1xf32>
    %cst_141 = arith.constant 3.200000e+01 : f32
    %382 = vector.broadcast %cst_141 : f32 to vector<8x1xf32>
    %383 = arith.divf %381, %382 : vector<8x1xf32>
    %cst_142 = arith.constant 9.99999974E-6 : f32
    %384 = vector.broadcast %cst_142 : f32 to vector<8x1xf32>
    %385 = arith.addf %383, %384 : vector<8x1xf32>
    %386 = math.rsqrt %385 : vector<8x1xf32>
    %387 = vector.broadcast %386 : vector<8x1xf32> to vector<8x32xf32>
    %388 = arith.mulf %378, %387 : vector<8x32xf32>
    %389 = vector.broadcast %5 : vector<1x32xf32> to vector<8x32xf32>
    %390 = arith.mulf %388, %389 : vector<8x32xf32>
    %391 = vector.broadcast %6 : vector<1x32xf32> to vector<8x32xf32>
    %392 = arith.addf %390, %391 : vector<8x32xf32>
    %393 = arith.index_cast %c5_i32 : i32 to index
    %c0_143 = arith.constant 0 : index
    %c0_144 = arith.constant 0 : index
    %394 = vector.load %arg2[%393, %c0_143, %c0_144] : memref<8x8x32xf32, #tpu.memory_space<vmem>>, vector<1x8x32xf32>
    %395 = vector.shape_cast %394 : vector<1x8x32xf32> to vector<8x32xf32>
    %396 = arith.addf %392, %395 : vector<8x32xf32>
    %397 = arith.index_cast %c5_i32 : i32 to index
    %c0_145 = arith.constant 0 : index
    %c0_146 = arith.constant 0 : index
    %398 = vector.load %arg8[%397, %c0_145, %c0_146] : memref<8x8x32xf32, #tpu.memory_space<vmem>>, vector<1x8x32xf32>
    %399 = vector.shape_cast %398 : vector<1x8x32xf32> to vector<8x32xf32>
    %400 = vector.shape_cast %396 : vector<8x32xf32> to vector<1x8x32xf32>
    tpu.vector_store %arg8[%397, %c0_145, %c0_146], %400 {strides = array<i32>} : memref<8x8x32xf32, #tpu.memory_space<vmem>>, vector<1x8x32xf32>,
    %c6_i32 = arith.constant 6 : i32
    %401 = arith.index_cast %c6_i32 : i32 to index
    %c0_147 = arith.constant 0 : index
    %c0_148 = arith.constant 0 : index
    %402 = vector.load %arg9[%401, %c0_147, %c0_148] : memref<8x8x128xf32, #tpu.memory_space<vmem>>, vector<1x8x128xf32>
    %403 = vector.shape_cast %402 : vector<1x8x128xf32> to vector<8x128xf32>
    %cst_149 = arith.constant dense<0.000000e+00> : vector<8x128xf32>
    %404 = tpu.matmul %372, %4, %cst_149 {dimension_numbers = #tpu.dot_dimension_numbers<[1], [0], [0], [1], [0, 0, 1, 1], [], []>} : vector<8x32xf32>, vector<32x128xf32>, vector<8x128xf32> -> vector<8x128xf32>
    %405 = arith.addf %403, %404 : vector<8x128xf32>
    %406 = vector.extract_strided_slice %405 {offsets = [0, 0], sizes = [8, 32], strides = [1, 1]} : vector<8x128xf32> to vector<8x32xf32>
    %cst_150 = arith.constant 5.000000e-01 : f32
    %407 = vector.broadcast %cst_150 : f32 to vector<8x32xf32>
    %408 = arith.mulf %407, %406 : vector<8x32xf32>
    %409 = math.tanh %408 : vector<8x32xf32>
    %cst_151 = arith.constant 1.000000e+00 : f32
    %410 = vector.broadcast %cst_151 : f32 to vector<8x32xf32>
    %411 = arith.addf %409, %410 : vector<8x32xf32>
    %cst_152 = arith.constant 5.000000e-01 : f32
    %412 = vector.broadcast %cst_152 : f32 to vector<8x32xf32>
    %413 = arith.mulf %412, %411 : vector<8x32xf32>
    %414 = vector.extract_strided_slice %405 {offsets = [0, 32], sizes = [8, 32], strides = [1, 1]} : vector<8x128xf32> to vector<8x32xf32>
    %cst_153 = arith.constant 5.000000e-01 : f32
    %415 = vector.broadcast %cst_153 : f32 to vector<8x32xf32>
    %416 = arith.mulf %415, %414 : vector<8x32xf32>
    %417 = math.tanh %416 : vector<8x32xf32>
    %cst_154 = arith.constant 1.000000e+00 : f32
    %418 = vector.broadcast %cst_154 : f32 to vector<8x32xf32>
    %419 = arith.addf %417, %418 : vector<8x32xf32>
    %cst_155 = arith.constant 5.000000e-01 : f32
    %420 = vector.broadcast %cst_155 : f32 to vector<8x32xf32>
    %421 = arith.mulf %420, %419 : vector<8x32xf32>
    %422 = vector.extract_strided_slice %405 {offsets = [0, 64], sizes = [8, 32], strides = [1, 1]} : vector<8x128xf32> to vector<8x32xf32>
    %423 = math.tanh %422 : vector<8x32xf32>
    %424 = vector.extract_strided_slice %405 {offsets = [0, 96], sizes = [8, 32], strides = [1, 1]} : vector<8x128xf32> to vector<8x32xf32>
    %cst_156 = arith.constant 5.000000e-01 : f32
    %425 = vector.broadcast %cst_156 : f32 to vector<8x32xf32>
    %426 = arith.mulf %425, %424 : vector<8x32xf32>
    %427 = math.tanh %426 : vector<8x32xf32>
    %cst_157 = arith.constant 1.000000e+00 : f32
    %428 = vector.broadcast %cst_157 : f32 to vector<8x32xf32>
    %429 = arith.addf %427, %428 : vector<8x32xf32>
    %cst_158 = arith.constant 5.000000e-01 : f32
    %430 = vector.broadcast %cst_158 : f32 to vector<8x32xf32>
    %431 = arith.mulf %430, %429 : vector<8x32xf32>
    %432 = arith.mulf %421, %370 : vector<8x32xf32>
    %433 = arith.mulf %413, %423 : vector<8x32xf32>
    %434 = arith.addf %432, %433 : vector<8x32xf32>
    %435 = math.tanh %434 : vector<8x32xf32>
    %436 = arith.mulf %431, %435 : vector<8x32xf32>
    %cst_159 = arith.constant dense<0.000000e+00> : vector<8xf32>
    %437 = vector.multi_reduction <add>, %436, %cst_159 [1] : vector<8x32xf32> to vector<8xf32>
    %438 = vector.shape_cast %437 : vector<8xf32> to vector<8x1xf32>
    %cst_160 = arith.constant 3.200000e+01 : f32
    %439 = vector.broadcast %cst_160 : f32 to vector<8x1xf32>
    %440 = arith.divf %438, %439 : vector<8x1xf32>
    %441 = vector.broadcast %440 : vector<8x1xf32> to vector<8x32xf32>
    %442 = arith.subf %436, %441 : vector<8x32xf32>
    %443 = arith.mulf %442, %442 : vector<8x32xf32>
    %cst_161 = arith.constant dense<0.000000e+00> : vector<8xf32>
    %444 = vector.multi_reduction <add>, %443, %cst_161 [1] : vector<8x32xf32> to vector<8xf32>
    %445 = vector.shape_cast %444 : vector<8xf32> to vector<8x1xf32>
    %cst_162 = arith.constant 3.200000e+01 : f32
    %446 = vector.broadcast %cst_162 : f32 to vector<8x1xf32>
    %447 = arith.divf %445, %446 : vector<8x1xf32>
    %cst_163 = arith.constant 9.99999974E-6 : f32
    %448 = vector.broadcast %cst_163 : f32 to vector<8x1xf32>
    %449 = arith.addf %447, %448 : vector<8x1xf32>
    %450 = math.rsqrt %449 : vector<8x1xf32>
    %451 = vector.broadcast %450 : vector<8x1xf32> to vector<8x32xf32>
    %452 = arith.mulf %442, %451 : vector<8x32xf32>
    %453 = vector.broadcast %5 : vector<1x32xf32> to vector<8x32xf32>
    %454 = arith.mulf %452, %453 : vector<8x32xf32>
    %455 = vector.broadcast %6 : vector<1x32xf32> to vector<8x32xf32>
    %456 = arith.addf %454, %455 : vector<8x32xf32>
    %457 = arith.index_cast %c6_i32 : i32 to index
    %c0_164 = arith.constant 0 : index
    %c0_165 = arith.constant 0 : index
    %458 = vector.load %arg2[%457, %c0_164, %c0_165] : memref<8x8x32xf32, #tpu.memory_space<vmem>>, vector<1x8x32xf32>
    %459 = vector.shape_cast %458 : vector<1x8x32xf32> to vector<8x32xf32>
    %460 = arith.addf %456, %459 : vector<8x32xf32>
    %461 = arith.index_cast %c6_i32 : i32 to index
    %c0_166 = arith.constant 0 : index
    %c0_167 = arith.constant 0 : index
    %462 = vector.load %arg8[%461, %c0_166, %c0_167] : memref<8x8x32xf32, #tpu.memory_space<vmem>>, vector<1x8x32xf32>
    %463 = vector.shape_cast %462 : vector<1x8x32xf32> to vector<8x32xf32>
    %464 = vector.shape_cast %460 : vector<8x32xf32> to vector<1x8x32xf32>
    tpu.vector_store %arg8[%461, %c0_166, %c0_167], %464 {strides = array<i32>} : memref<8x8x32xf32, #tpu.memory_space<vmem>>, vector<1x8x32xf32>,
    %c7_i32 = arith.constant 7 : i32
    %465 = arith.index_cast %c7_i32 : i32 to index
    %c0_168 = arith.constant 0 : index
    %c0_169 = arith.constant 0 : index
    %466 = vector.load %arg9[%465, %c0_168, %c0_169] : memref<8x8x128xf32, #tpu.memory_space<vmem>>, vector<1x8x128xf32>
    %467 = vector.shape_cast %466 : vector<1x8x128xf32> to vector<8x128xf32>
    %cst_170 = arith.constant dense<0.000000e+00> : vector<8x128xf32>
    %468 = tpu.matmul %436, %4, %cst_170 {dimension_numbers = #tpu.dot_dimension_numbers<[1], [0], [0], [1], [0, 0, 1, 1], [], []>} : vector<8x32xf32>, vector<32x128xf32>, vector<8x128xf32> -> vector<8x128xf32>
    %469 = arith.addf %467, %468 : vector<8x128xf32>
    %470 = vector.extract_strided_slice %469 {offsets = [0, 0], sizes = [8, 32], strides = [1, 1]} : vector<8x128xf32> to vector<8x32xf32>
    %cst_171 = arith.constant 5.000000e-01 : f32
    %471 = vector.broadcast %cst_171 : f32 to vector<8x32xf32>
    %472 = arith.mulf %471, %470 : vector<8x32xf32>
    %473 = math.tanh %472 : vector<8x32xf32>
    %cst_172 = arith.constant 1.000000e+00 : f32
    %474 = vector.broadcast %cst_172 : f32 to vector<8x32xf32>
    %475 = arith.addf %473, %474 : vector<8x32xf32>
    %cst_173 = arith.constant 5.000000e-01 : f32
    %476 = vector.broadcast %cst_173 : f32 to vector<8x32xf32>
    %477 = arith.mulf %476, %475 : vector<8x32xf32>
    %478 = vector.extract_strided_slice %469 {offsets = [0, 32], sizes = [8, 32], strides = [1, 1]} : vector<8x128xf32> to vector<8x32xf32>
    %cst_174 = arith.constant 5.000000e-01 : f32
    %479 = vector.broadcast %cst_174 : f32 to vector<8x32xf32>
    %480 = arith.mulf %479, %478 : vector<8x32xf32>
    %481 = math.tanh %480 : vector<8x32xf32>
    %cst_175 = arith.constant 1.000000e+00 : f32
    %482 = vector.broadcast %cst_175 : f32 to vector<8x32xf32>
    %483 = arith.addf %481, %482 : vector<8x32xf32>
    %cst_176 = arith.constant 5.000000e-01 : f32
    %484 = vector.broadcast %cst_176 : f32 to vector<8x32xf32>
    %485 = arith.mulf %484, %483 : vector<8x32xf32>
    %486 = vector.extract_strided_slice %469 {offsets = [0, 64], sizes = [8, 32], strides = [1, 1]} : vector<8x128xf32> to vector<8x32xf32>
    %487 = math.tanh %486 : vector<8x32xf32>
    %488 = vector.extract_strided_slice %469 {offsets = [0, 96], sizes = [8, 32], strides = [1, 1]} : vector<8x128xf32> to vector<8x32xf32>
    %cst_177 = arith.constant 5.000000e-01 : f32
    %489 = vector.broadcast %cst_177 : f32 to vector<8x32xf32>
    %490 = arith.mulf %489, %488 : vector<8x32xf32>
    %491 = math.tanh %490 : vector<8x32xf32>
    %cst_178 = arith.constant 1.000000e+00 : f32
    %492 = vector.broadcast %cst_178 : f32 to vector<8x32xf32>
    %493 = arith.addf %491, %492 : vector<8x32xf32>
    %cst_179 = arith.constant 5.000000e-01 : f32
    %494 = vector.broadcast %cst_179 : f32 to vector<8x32xf32>
    %495 = arith.mulf %494, %493 : vector<8x32xf32>
    %496 = arith.mulf %485, %434 : vector<8x32xf32>
    %497 = arith.mulf %477, %487 : vector<8x32xf32>
    %498 = arith.addf %496, %497 : vector<8x32xf32>
    %499 = math.tanh %498 : vector<8x32xf32>
    %500 = arith.mulf %495, %499 : vector<8x32xf32>
    %cst_180 = arith.constant dense<0.000000e+00> : vector<8xf32>
    %501 = vector.multi_reduction <add>, %500, %cst_180 [1] : vector<8x32xf32> to vector<8xf32>
    %502 = vector.shape_cast %501 : vector<8xf32> to vector<8x1xf32>
    %cst_181 = arith.constant 3.200000e+01 : f32
    %503 = vector.broadcast %cst_181 : f32 to vector<8x1xf32>
    %504 = arith.divf %502, %503 : vector<8x1xf32>
    %505 = vector.broadcast %504 : vector<8x1xf32> to vector<8x32xf32>
    %506 = arith.subf %500, %505 : vector<8x32xf32>
    %507 = arith.mulf %506, %506 : vector<8x32xf32>
    %cst_182 = arith.constant dense<0.000000e+00> : vector<8xf32>
    %508 = vector.multi_reduction <add>, %507, %cst_182 [1] : vector<8x32xf32> to vector<8xf32>
    %509 = vector.shape_cast %508 : vector<8xf32> to vector<8x1xf32>
    %cst_183 = arith.constant 3.200000e+01 : f32
    %510 = vector.broadcast %cst_183 : f32 to vector<8x1xf32>
    %511 = arith.divf %509, %510 : vector<8x1xf32>
    %cst_184 = arith.constant 9.99999974E-6 : f32
    %512 = vector.broadcast %cst_184 : f32 to vector<8x1xf32>
    %513 = arith.addf %511, %512 : vector<8x1xf32>
    %514 = math.rsqrt %513 : vector<8x1xf32>
    %515 = vector.broadcast %514 : vector<8x1xf32> to vector<8x32xf32>
    %516 = arith.mulf %506, %515 : vector<8x32xf32>
    %517 = vector.broadcast %5 : vector<1x32xf32> to vector<8x32xf32>
    %518 = arith.mulf %516, %517 : vector<8x32xf32>
    %519 = vector.broadcast %6 : vector<1x32xf32> to vector<8x32xf32>
    %520 = arith.addf %518, %519 : vector<8x32xf32>
    %521 = arith.index_cast %c7_i32 : i32 to index
    %c0_185 = arith.constant 0 : index
    %c0_186 = arith.constant 0 : index
    %522 = vector.load %arg2[%521, %c0_185, %c0_186] : memref<8x8x32xf32, #tpu.memory_space<vmem>>, vector<1x8x32xf32>
    %523 = vector.shape_cast %522 : vector<1x8x32xf32> to vector<8x32xf32>
    %524 = arith.addf %520, %523 : vector<8x32xf32>
    %525 = arith.index_cast %c7_i32 : i32 to index
    %c0_187 = arith.constant 0 : index
    %c0_188 = arith.constant 0 : index
    %526 = vector.load %arg8[%525, %c0_187, %c0_188] : memref<8x8x32xf32, #tpu.memory_space<vmem>>, vector<1x8x32xf32>
    %527 = vector.shape_cast %526 : vector<1x8x32xf32> to vector<8x32xf32>
    %528 = vector.shape_cast %524 : vector<8x32xf32> to vector<1x8x32xf32>
    tpu.vector_store %arg8[%525, %c0_187, %c0_188], %528 {strides = array<i32>} : memref<8x8x32xf32, #tpu.memory_space<vmem>>, vector<1x8x32xf32>,
    %c8_i32 = arith.constant 8 : i32
    %c0_189 = arith.constant 0 : index
    %c0_190 = arith.constant 0 : index
    %529 = vector.load %arg10[%c0_189, %c0_190] : memref<8x32xf32, #tpu.memory_space<vmem>>, vector<8x32xf32>
    tpu.vector_store %arg10[%c0_189, %c0_190], %500 {strides = array<i32>} : memref<8x32xf32, #tpu.memory_space<vmem>>, vector<8x32xf32>,
    %c0_191 = arith.constant 0 : index
    %c0_192 = arith.constant 0 : index
    %530 = vector.load %arg11[%c0_191, %c0_192] : memref<8x32xf32, #tpu.memory_space<vmem>>, vector<8x32xf32>
    tpu.vector_store %arg11[%c0_191, %c0_192], %498 {strides = array<i32>} : memref<8x32xf32, #tpu.memory_space<vmem>>, vector<8x32xf32>,
    return
  }
  func.func @transform_0(%arg0: i32, %arg1: i32) -> (i32, i32, i32) {
    %c0_i32 = arith.constant 0 : i32
    %c0_i32_0 = arith.constant 0 : i32
    return %arg1, %arg0, %c0_i32 : i32, i32, i32
  }
  func.func @transform_1(%arg0: i32, %arg1: i32) -> (i32, i32) {
    %c0_i32 = arith.constant 0 : i32
    %c0_i32_0 = arith.constant 0 : i32
    %c0_i32_1 = arith.constant 0 : i32
    return %c0_i32, %c0_i32_0 : i32, i32
  }
  func.func @transform_2(%arg0: i32, %arg1: i32) -> (i32, i32) {
    %c0_i32 = arith.constant 0 : i32
    %c0_i32_0 = arith.constant 0 : i32
    %c0_i32_1 = arith.constant 0 : i32
    return %c0_i32, %c0_i32_0 : i32, i32
  }
  func.func @transform_3(%arg0: i32, %arg1: i32) -> (i32, i32) {
    %c0_i32 = arith.constant 0 : i32
    %c0_i32_0 = arith.constant 0 : i32
    %c0_i32_1 = arith.constant 0 : i32
    return %c0_i32, %c0_i32_0 : i32, i32
  }
  func.func @transform_4(%arg0: i32, %arg1: i32) -> (i32, i32) {
    %c0_i32 = arith.constant 0 : i32
    %c0_i32_0 = arith.constant 0 : i32
    %c0_i32_1 = arith.constant 0 : i32
    return %c0_i32, %c0_i32_0 : i32, i32
  }
  func.func @transform_5(%arg0: i32, %arg1: i32) -> (i32, i32) {
    %c0_i32 = arith.constant 0 : i32
    %c0_i32_0 = arith.constant 0 : i32
    %c0_i32_1 = arith.constant 0 : i32
    return %c0_i32, %c0_i32_0 : i32, i32
  }
  func.func @transform_6(%arg0: i32, %arg1: i32) -> (i32, i32, i32) {
    %c0_i32 = arith.constant 0 : i32
    %c0_i32_0 = arith.constant 0 : i32
    return %arg1, %arg0, %c0_i32 : i32, i32, i32
  }
}

</mosaic_0001>

<bundles_post_ra>
// kernel: tpu_custom_call.1
= control target key start
LH: loop header
LB: loop body
LE: loop exit
PB: predicated region body
PF: predicated region fallthrough
CT: control target
= control target key end

     0   :  { %11 = vsyncpa [#allocation6], 0  ;;  %s1575_s0 = inlined_call_operand.hbm [shape: f32[8,8,32], index: 0, kind: input, shape index: {}]   ;;  %s1576_s1 = inlined_call_operand.hbm [shape: f32[32,128], index: 1, kind: input, shape index: {}]   ;;  %s1577_s2 = inlined_call_operand.hbm [shape: f32[32,128], index: 2, kind: input, shape index: {}]   ;;  %s1578_s3 = inlined_call_operand.vmem [shape: f32[1,128], index: 3, kind: input, shape index: {}]   ;;  %s1579_s4 = inlined_call_operand.vmem [shape: f32[1,32], index: 4, kind: input, shape index: {}]   ;;  %s1580_s5 = inlined_call_operand.vmem [shape: f32[1,32], index: 5, kind: input, shape index: {}]   ;;  %s1581_s6 = inlined_call_operand.hbm [shape: f32[8,8,32], index: 6, kind: output, shape index: {}]  }
   0x1   :  { %12 = vsyncpa [#allocation9], 0 }
   0x2   :  { %13 = vsyncpa [#allocation7], 0  ;;  %s31_s23 = sshll.u32 %s1576_s1, 4  ;;  %s1167_s24 = smov [#allocation8]   ;;  %s32_s23 = int_to_ptr.hbm [resolvable:$true] %s31_s23 }
   0x3   :  { %s33_s25 = sshll.u32 %s1167_s24, 4  ;;  %s18_s28 = sshll.u32 %s1575_s0, 4  ;;  %s34_s25 = int_to_ptr.vmem [resolvable:$true] %s33_s25  ;;  %s19_s28 = int_to_ptr.hbm [resolvable:$true] %s18_s28 }
   0x4   :  { %s1168_s29 = smov 128   ;;  %s1169_s30 = smov 8  }
   0x5   :  { %39 = dma.hbm_to_vmem [thread:$0]  %s32_s23, 512, %s34_s25, [#allocation9], %s1168_s29, %s1168_s29, %s1169_s30  }
   0x6   :  { %s1170_s7 = smov [#allocation5]   ;;  %s44_s1 = sshll.u32 %s1577_s2, 4  ;;  %s45_s1 = int_to_ptr.hbm [resolvable:$true] %s44_s1 }
   0x7   :  { %s20_s8 = sshll.u32 %s1170_s7, 4  ;;  %s1171_s0 = smov [#allocation10]   ;;  %s21_s8 = int_to_ptr.vmem [resolvable:$true] %s20_s8 }
   0x8   :  { %26 = dma.hbm_to_vmem [thread:$0]  %s19_s28, 1024, %s21_s8, [#allocation6], %s1168_s29, %s1168_s29, %s1169_s30  }
   0x9   :  { %s46_s11 = sshll.u32 %s1171_s0, 4  ;;  %s47_s11 = int_to_ptr.vmem [resolvable:$true] %s46_s11 }
   0xa   :  { %52 = dma.hbm_to_vmem [thread:$0]  %s45_s1, 512, %s47_s11, [#allocation9], %s1168_s29, %s1168_s29, %s1169_s30  }
   0xb   :  { %1161 = dma.done.wait [#allocation6], 1024  }
   0xc   :  { %1162 = vsyncadd [#allocation6], 4294966272 }
   0xd   :  { %1163 = dma.done.wait [#allocation9], 1024  }
   0xe   :  { %1164 = vsyncadd [#allocation9], 4294966272  ;;  %vm75_vm0 = vcmask 261120   ;;  %v1172_v0 = vmov 0.0   ;;  %v81_v1 = vld [vmem:[#allocation8 + $0x18] sm:$0xff]  ;;  %v80_v2 = vld [vmem:[#allocation8 + $0x10] sm:$0xff] }
   0xf   :  { %76 = vst.msk [vmem:[#allocation3] sm:$0xff] %vm75_vm0, %v1172_v0  ;;  %973 = vmatpush.msra.mxu1 %v81_v1  ;;  %137 = vmatpush.msra.mxu0 %v81_v1  ;;  %v79_v3 = vld [vmem:[#allocation8 + $0x8] sm:$0xff]  ;;  %v78_v4 = vld [vmem:[#allocation8] sm:$0xff]  ;;  %v1237_v7 = vld [vmem:[#allocation10 + $0x18] sm:$0xff]  ;;  %s1173_s13 = smov 64   ;;  %s1174_s14 = smov 32  }
  0x10   :  { %77 = vst.msk [vmem:[#allocation4] sm:$0xff] %vm75_vm0, %v1172_v0  ;;  %974 = vmatpush.msra.mxu2 %v81_v1  ;;  %975 = vmatpush.msra.mxu3 %v81_v1  ;;  %v1233_v5 = vld [vmem:[#allocation5 + $0x20] sm:$0xff]  ;;  %v1241_v8 = vld [vmem:[#allocation10 + $0x10] sm:$0xff]  ;;  %v1246_v9 = vld [vmem:[#allocation10 + $0x8] sm:$0xff]  ;;  %s943_s21 = sshll.u32 %s1581_s6, 4  ;;  %s944_s21 = int_to_ptr.hbm [resolvable:$true] %s943_s21 }
  0x11   :  { %976 = vmatpush.msra.mxu1 %v80_v2  ;;  %138 = vmatpush.msra.mxu0 %v80_v2  ;;  %v1235_v6 = vld [vmem:[#allocation5] sm:$0xff]  ;;  %v1275_v14 = vld [vmem:[%s1578_s3] ss:$0 sm:$0xff]  ;;  %v1282_v31 = vld [vmem:[#allocation5 + $0x28] sm:$0xff]  ;;  %s1176_s3 = smov 96  }
  0x12   :  { %977 = vmatpush.msra.mxu2 %v80_v2  ;;  %978 = vmatpush.msra.mxu3 %v80_v2  ;;  %v1251_v10 = vld [vmem:[#allocation10] sm:$0xff]  ;;  %v1294_v34 = vld [vmem:[#allocation5 + $0x8] sm:$0xff]  ;;  %v1312_v52 = vld [vmem:[#allocation5 + $0x30] sm:$0xff] }
  0x13   :  { %979 = vmatpush.msra.mxu1 %v79_v3  ;;  %139 = vmatpush.msra.mxu0 %v79_v3  ;;  %v1318_v53 = vld [vmem:[#allocation5 + $0x38] sm:$0xff]  ;;  %v1328_v56 = vld [vmem:[#allocation5 + $0x10] sm:$0xff] }
  0x14   :  { %980 = vmatpush.msra.mxu2 %v79_v3  ;;  %981 = vmatpush.msra.mxu3 %v79_v3 }
  0x15   :  { %982 = vmatpush.msra.mxu1 %v78_v4  ;;  %140 = vmatpush.msra.mxu0 %v78_v4 }
  0x16   :  { %961 = vmatmul.msk.f32.vlgmr.msra.gmra.mxu1 %vm75_vm0, %v1233_v5  ;;  %957 = vmatmul.msk.f32.vlgmr.msra.gmra.mxu0 %vm75_vm0, %v1235_v6  ;;  %v174_v11 = vld [vmem:[#allocation3] sm:$0xff] }
  0x17   :  { %192 = vmatpush.msrb.mxu1 %v1237_v7  ;;  %983 = vmatpush.msra.mxu2 %v78_v4  ;;  %v175_v19 = vld [vmem:[#allocation4] sm:$0xff] }
  0x18   :  { %984 = vmatpush.msra.mxu3 %v78_v4  ;;  %962 = vmatmul.msk.f32.vlgmr.msra.gmra.mxu2 %vm75_vm0, %v1282_v31 }
  0x19   :  { %303 = vmatpush.msrb.mxu2 %v1237_v7  ;;  %193 = vmatpush.msrb.mxu1 %v1241_v8 }
  0x1a   :  { %395 = vmatpush.msrb.mxu3 %v1237_v7 }
  0x1b   :  { %304 = vmatpush.msrb.mxu2 %v1241_v8  ;;  %194 = vmatpush.msrb.mxu1 %v1246_v9 }
  0x1c   :  { %396 = vmatpush.msrb.mxu3 %v1241_v8 }
  0x1d   :  { %305 = vmatpush.msrb.mxu2 %v1246_v9  ;;  %195 = vmatpush.msrb.mxu1 %v1251_v10 }
  0x1e   :  { %397 = vmatpush.msrb.mxu3 %v1246_v9  ;;  %965 = vmatmul.msk.f32.vlgmr.msrb.gmra.mxu1 %vm75_vm0, %v174_v11 }
  0x1f   :  { %306 = vmatpush.msrb.mxu2 %v1251_v10  ;;  %487 = vmatpush.msra.mxu1 %v1237_v7 }
  0x20   :  { %398 = vmatpush.msrb.mxu3 %v1251_v10  ;;  %958 = vmatmul.msk.f32.gmra.mxu0 %vm75_vm0, %v1294_v34 }
  0x21   :  { %488 = vmatpush.msra.mxu1 %v1241_v8  ;;  %579 = vmatpush.msra.mxu2 %v1237_v7 }
  0x22   :  { %963 = vmatmul.msk.f32.vlgmr.msra.gmra.mxu3 %vm75_vm0, %v1312_v52 }
  0x23   :  { %489 = vmatpush.msra.mxu1 %v1246_v9  ;;  %580 = vmatpush.msra.mxu2 %v1241_v8 }
  0x24   :  { %671 = vmatpush.msra.mxu3 %v1237_v7 }
  0x25   :  { %490 = vmatpush.msra.mxu1 %v1251_v10  ;;  %581 = vmatpush.msra.mxu2 %v1246_v9 }
  0x26   :  { %672 = vmatpush.msra.mxu3 %v1241_v8 }
  0x27   :  { %763 = vmatpush.msrb.mxu1 %v1237_v7  ;;  %582 = vmatpush.msra.mxu2 %v1251_v10 }
  0x28   :  { %673 = vmatpush.msra.mxu3 %v1246_v9  ;;  %959 = vmatmul.msk.f32.gmra.mxu0 %vm75_vm0, %v1328_v56 }
  0x29   :  { %764 = vmatpush.msrb.mxu1 %v1241_v8 }
  0x2a   :  { %674 = vmatpush.msra.mxu3 %v1251_v10 }
  0x2b   :  { %765 = vmatpush.msrb.mxu1 %v1246_v9  ;;  %964 = vmatmul.msk.f32.gmra.mxu3 %vm75_vm0, %v1318_v53 }
  0x2d   :  { %766 = vmatpush.msrb.mxu1 %v1251_v10 }
  0x93   :  { %v1270_v12 = vpop.f32.mrf.mxu1  ;;  %v142_v13 = vpop.f32.mrf.mxu0 }
  0x94   :  { %v143_v15 = vadd.f32 %v1275_v14, %v142_v13 }
  0x9b   :  { %v197_v16 = vpop.f32.mrf.mxu1  ;;  %v1306_v36 = vpop.f32.mrf.mxu2 }
  0x9c   :  { %v200_v17 = vadd.f32 %v197_v16, %v143_v15  ;;  %v1344_v15 = vld [vmem:[#allocation5 + $0x18] sm:$0xff] }
  0x9d   :  { %v145_v37 = vpop.f32.mrf.mxu0  ;;  %960 = vmatmul.msk.f32.gmra.mxu0 %vm75_vm0, %v1344_v15 }
  0x9e   :  { %999 = vtanh.f32 %v200_v17  ;;  %v201_v20 = vmul.f32 0.5, %v200_v17  ;;  %v146_v38 = vadd.f32 %v1275_v14, %v145_v37 }
  0xa0   :  { %1001 = vtanh.f32 %v201_v20 }
  0xa4   :  { %v1000_v18 = vpop.eup %999 }
  0xa5   :  { %212 = vrot.lane.b32.xlu0 %v1000_v18, %s1173_s13  ;;  %v1336_v58 = vpop.f32.mrf.mxu3  ;;  %v148_v60 = vpop.f32.mrf.mxu0 }
  0xa6   :  { %v1002_v21 = vpop.eup %1001  ;;  %v149_v61 = vadd.f32 %v1275_v14, %v148_v60 }
  0xa7   :  { %v203_v22 = vadd.f32 1.0, %v1002_v21 }
  0xa9   :  { %v204_v23 = vmul.f32 0.5, %v203_v22 }
  0xad   :  { %207 = vrot.lane.b32.xlu0 %v175_v19, %s1174_s14 }
  0xae   :  { %v1338_v59 = vpop.f32.mrf.mxu3 }
 0x117   :  { %v213_v24 = vpop.permute.xlu0 %212 }
 0x118   :  { %v215_v25 = vmul.f32 %v213_v24, %v204_v23 }
 0x11a   :  { %217 = vrot.lane.b32.xlu1 %v215_v25, %s1174_s14  ;;  %v151_v19 = vpop.f32.mrf.mxu0 }
 0x11b   :  { %v152_v20 = vadd.f32 %v1275_v14, %v151_v19 }
 0x11f   :  { %v208_v26 = vpop.permute.xlu0 %207 }
 0x120   :  { %v210_v27 = vmul.f32 %v208_v26, %v204_v23 }
 0x18c   :  { %v218_v28 = vpop.permute.xlu1 %217 }
 0x18d   :  { %v220_v29 = vadd.f32 %v218_v28, %v210_v27 }
 0x18f   :  { %1003 = vtanh.f32 %v220_v29 }
 0x195   :  { %v1004_v30 = vpop.eup %1003 }
 0x196   :  { %223 = vrot.lane.b32.xlu1 %v1004_v30, %s1173_s13 }
 0x208   :  { %v224_v32 = vpop.permute.xlu1 %223 }
 0x209   :  { %v1290_v33 = vmul.f32 %v224_v32, %v204_v23 }
 0x20b   :  { %228 = vrot.lane.b32.xlu2 %v1290_v33, %s1174_s14 }
 0x265   :  { %v1298_v35 = vpop.permute.xlu2 %228 }
 0x266   :  { %966 = vmatmul.msk.f32.vlgmr.msrb.gmra.mxu2 %vm75_vm0, %v1298_v35 }
 0x267   :  { %855 = vmatpush.msrb.mxu2 %v1237_v7 }
 0x269   :  { %856 = vmatpush.msrb.mxu2 %v1241_v8 }
 0x26b   :  { %857 = vmatpush.msrb.mxu2 %v1246_v9 }
 0x26d   :  { %858 = vmatpush.msrb.mxu2 %v1251_v10 }
 0x2e9   :  { %v308_v39 = vpop.f32.mrf.mxu2 }
 0x2ea   :  { %v311_v40 = vadd.f32 %v308_v39, %v146_v38 }
 0x2ec   :  { %1005 = vtanh.f32 %v311_v40  ;;  %v312_v42 = vmul.f32 0.5, %v311_v40 }
 0x2ee   :  { %1007 = vtanh.f32 %v312_v42  ;;  %v155_v42 = vadd.f32 %v1275_v14, %v1270_v12 }
 0x2f2   :  { %v1006_v41 = vpop.eup %1005 }
 0x2f3   :  { %319 = vrot.lane.b32.xlu2 %v1006_v41, %s1173_s13 }
 0x2f4   :  { %v1008_v43 = vpop.eup %1007 }
 0x2f5   :  { %v314_v44 = vadd.f32 1.0, %v1008_v43 }
 0x2f7   :  { %v315_v45 = vmul.f32 0.5, %v314_v44 }
 0x2f9   :  { %v317_v48 = vmul.f32 %v315_v45, %v220_v29 }
 0x34d   :  { %v320_v46 = vpop.permute.xlu2 %319 }
 0x34e   :  { %v322_v47 = vmul.f32 %v320_v46, %v315_v45 }
 0x350   :  { %324 = vrot.lane.b32.xlu0 %v322_v47, %s1174_s14 }
 0x3c2   :  { %v325_v49 = vpop.permute.xlu0 %324 }
 0x3c3   :  { %v327_v50 = vadd.f32 %v325_v49, %v317_v48 }
 0x3c5   :  { %1009 = vtanh.f32 %v327_v50 }
 0x3cb   :  { %v1010_v51 = vpop.eup %1009 }
 0x3cc   :  { %330 = vrot.lane.b32.xlu1 %v1010_v51, %s1173_s13 }
 0x43e   :  { %v331_v54 = vpop.permute.xlu1 %330 }
 0x43f   :  { %v1324_v55 = vmul.f32 %v331_v54, %v315_v45 }
 0x441   :  { %335 = vrot.lane.b32.xlu2 %v1324_v55, %s1174_s14 }
 0x49b   :  { %v1332_v57 = vpop.permute.xlu2 %335 }
 0x49c   :  { %967 = vmatmul.msk.f32.vlgmr.msrb.gmra.mxu3 %vm75_vm0, %v1332_v57 }
 0x51f   :  { %v400_v62 = vpop.f32.mrf.mxu3 }
 0x520   :  { %v403_v63 = vadd.f32 %v400_v62, %v149_v61 }
 0x522   :  { %1011 = vtanh.f32 %v403_v63  ;;  %v404_v1 = vmul.f32 0.5, %v403_v63 }
 0x524   :  { %1013 = vtanh.f32 %v404_v1  ;;  %v158_v1 = vadd.f32 %v1275_v14, %v1306_v36 }
 0x528   :  { %v1012_v0 = vpop.eup %1011 }
 0x529   :  { %411 = vrot.lane.b32.xlu0 %v1012_v0, %s1173_s13 }
 0x52a   :  { %v1014_v2 = vpop.eup %1013 }
 0x52b   :  { %v406_v3 = vadd.f32 1.0, %v1014_v2 }
 0x52d   :  { %v407_v4 = vmul.f32 0.5, %v406_v3 }
 0x52f   :  { %v409_v9 = vmul.f32 %v407_v4, %v327_v50 }
 0x59b   :  { %v412_v7 = vpop.permute.xlu0 %411 }
 0x59c   :  { %v414_v8 = vmul.f32 %v412_v7, %v407_v4 }
 0x59e   :  { %416 = vrot.lane.b32.xlu1 %v414_v8, %s1174_s14 }
 0x610   :  { %v417_v10 = vpop.permute.xlu1 %416 }
 0x611   :  { %v419_v11 = vadd.f32 %v417_v10, %v409_v9 }
 0x613   :  { %1015 = vtanh.f32 %v419_v11 }
 0x619   :  { %v1016_v13 = vpop.eup %1015 }
 0x61a   :  { %422 = vrot.lane.b32.xlu2 %v1016_v13, %s1173_s13 }
 0x674   :  { %v423_v16 = vpop.permute.xlu2 %422 }
 0x675   :  { %v1348_v17 = vmul.f32 %v423_v16, %v407_v4 }
 0x677   :  { %427 = vrot.lane.b32.xlu0 %v1348_v17, %s1174_s14 }
 0x6e9   :  { %v1352_v18 = vpop.permute.xlu0 %427 }
 0x6ea   :  { %968 = vmatmul.msk.f32.vlgmr.msra.gmra.mxu1 %vm75_vm0, %v1352_v18 }
 0x767   :  { %v492_v21 = vpop.f32.mrf.mxu1 }
 0x768   :  { %v495_v22 = vadd.f32 %v492_v21, %v152_v20 }
 0x76a   :  { %1017 = vtanh.f32 %v495_v22  ;;  %v496_v24 = vmul.f32 0.5, %v495_v22 }
 0x76c   :  { %1019 = vtanh.f32 %v496_v24  ;;  %v161_v24 = vadd.f32 %v1275_v14, %v1336_v58  ;;  %v338_v58 = vsel %vm75_vm0, %v1332_v57, 0.0 }
 0x770   :  { %v1018_v23 = vpop.eup %1017 }
 0x771   :  { %503 = vrot.lane.b32.xlu1 %v1018_v23, %s1173_s13 }
 0x772   :  { %v1020_v25 = vpop.eup %1019 }
 0x773   :  { %v498_v26 = vadd.f32 1.0, %v1020_v25 }
 0x775   :  { %v499_v27 = vmul.f32 0.5, %v498_v26 }
 0x777   :  { %v501_v30 = vmul.f32 %v499_v27, %v419_v11 }
 0x7e3   :  { %v504_v28 = vpop.permute.xlu1 %503 }
 0x7e4   :  { %v506_v29 = vmul.f32 %v504_v28, %v499_v27 }
 0x7e6   :  { %508 = vrot.lane.b32.xlu2 %v506_v29, %s1174_s14 }
 0x840   :  { %v509_v32 = vpop.permute.xlu2 %508 }
 0x841   :  { %v511_v37 = vadd.f32 %v509_v32, %v501_v30 }
 0x843   :  { %1021 = vtanh.f32 %v511_v37 }
 0x849   :  { %v1022_v38 = vpop.eup %1021 }
 0x84a   :  { %514 = vrot.lane.b32.xlu0 %v1022_v38, %s1173_s13 }
 0x8bc   :  { %v515_v39 = vpop.permute.xlu0 %514 }
 0x8bd   :  { %v1360_v40 = vmul.f32 %v515_v39, %v499_v27  ;;  %v231_v39 = vsel %vm75_vm0, %v1298_v35, 0.0 }
 0x8bf   :  { %519 = vrot.lane.b32.xlu1 %v1360_v40, %s1174_s14 }
 0x931   :  { %v1364_v41 = vpop.permute.xlu1 %519 }
 0x932   :  { %969 = vmatmul.msk.f32.vlgmr.msra.gmra.mxu2 %vm75_vm0, %v1364_v41 }
 0x9b5   :  { %v584_v43 = vpop.f32.mrf.mxu2 }
 0x9b6   :  { %v587_v44 = vadd.f32 %v584_v43, %v155_v42 }
 0x9b8   :  { %1023 = vtanh.f32 %v587_v44  ;;  %v588_v46 = vmul.f32 0.5, %v587_v44 }
 0x9ba   :  { %1025 = vtanh.f32 %v588_v46  ;;  %v1175_v46 = vmov 32.0  }
 0x9be   :  { %v1024_v45 = vpop.eup %1023 }
 0x9bf   :  { %595 = vrot.lane.b32.xlu2 %v1024_v45, %s1173_s13 }
 0x9c0   :  { %v1026_v47 = vpop.eup %1025 }
 0x9c1   :  { %v590_v48 = vadd.f32 1.0, %v1026_v47 }
 0x9c3   :  { %v591_v49 = vmul.f32 0.5, %v590_v48 }
 0x9c5   :  { %v593_v54 = vmul.f32 %v591_v49, %v511_v37 }
 0xa19   :  { %v596_v50 = vpop.permute.xlu2 %595 }
 0xa1a   :  { %v598_v51 = vmul.f32 %v596_v50, %v591_v49 }
 0xa1c   :  { %600 = vrot.lane.b32.xlu0 %v598_v51, %s1174_s14 }
 0xa8e   :  { %v601_v60 = vpop.permute.xlu0 %600 }
 0xa8f   :  { %v603_v61 = vadd.f32 %v601_v60, %v593_v54 }
 0xa91   :  { %1027 = vtanh.f32 %v603_v61 }
 0xa97   :  { %v1028_v12 = vpop.eup %1027 }
 0xa98   :  { %606 = vrot.lane.b32.xlu1 %v1028_v12, %s1173_s13 }
 0xb0a   :  { %v607_v62 = vpop.permute.xlu1 %606 }
 0xb0b   :  { %v1373_v63 = vmul.f32 %v607_v62, %v591_v49 }
 0xb0d   :  { %611 = vrot.lane.b32.xlu2 %v1373_v63, %s1174_s14 }
 0xb67   :  { %v1377_v0 = vpop.permute.xlu2 %611 }
 0xb68   :  { %970 = vmatmul.msk.f32.vlgmr.msra.gmra.mxu3 %vm75_vm0, %v1377_v0 }
 0xbeb   :  { %v676_v2 = vpop.f32.mrf.mxu3 }
 0xbec   :  { %v679_v3 = vadd.f32 %v676_v2, %v158_v1 }
 0xbee   :  { %1029 = vtanh.f32 %v679_v3  ;;  %v680_v7 = vmul.f32 0.5, %v679_v3 }
 0xbf0   :  { %1031 = vtanh.f32 %v680_v7 }
 0xbf4   :  { %v1030_v4 = vpop.eup %1029 }
 0xbf5   :  { %687 = vrot.lane.b32.xlu0 %v1030_v4, %s1173_s13 }
 0xbf6   :  { %v1032_v8 = vpop.eup %1031 }
 0xbf7   :  { %v682_v9 = vadd.f32 1.0, %v1032_v8  ;;  %v430_v8 = vsel %vm75_vm0, %v1352_v18, 0.0  ;;  %v998_v18 = vld [vmem:[%s1580_s5] ss:$0 sm:$0xff] }
 0xbf9   :  { %v683_v10 = vmul.f32 0.5, %v682_v9  ;;  %v164_v9 = vadd.f32 %v1275_v14, %v1338_v59 }
 0xbfb   :  { %v685_v16 = vmul.f32 %v683_v10, %v603_v61 }
 0xc67   :  { %v688_v11 = vpop.permute.xlu0 %687 }
 0xc68   :  { %v690_v13 = vmul.f32 %v688_v11, %v683_v10 }
 0xc6a   :  { %692 = vrot.lane.b32.xlu1 %v690_v13, %s1174_s14 }
 0xcdc   :  { %v693_v19 = vpop.permute.xlu1 %692 }
 0xcdd   :  { %v695_v20 = vadd.f32 %v693_v19, %v685_v16 }
 0xcdf   :  { %1033 = vtanh.f32 %v695_v20 }
 0xce5   :  { %v1034_v36 = vpop.eup %1033 }
 0xce6   :  { %698 = vrot.lane.b32.xlu2 %v1034_v36, %s1173_s13 }
 0xd40   :  { %v699_v21 = vpop.permute.xlu2 %698 }
 0xd41   :  { %v1386_v22 = vmul.f32 %v699_v21, %v683_v10 }
 0xd43   :  { %703 = vrot.lane.b32.xlu0 %v1386_v22, %s1174_s14 }
 0xdb5   :  { %v1390_v23 = vpop.permute.xlu0 %703 }
 0xdb6   :  { %971 = vmatmul.msk.f32.vlgmr.msrb.gmra.mxu1 %vm75_vm0, %v1390_v23 }
 0xe33   :  { %v768_v25 = vpop.f32.mrf.mxu1 }
 0xe34   :  { %v771_v26 = vadd.f32 %v768_v25, %v161_v24 }
 0xe36   :  { %1035 = vtanh.f32 %v771_v26  ;;  %v772_v28 = vmul.f32 0.5, %v771_v26 }
 0xe38   :  { %1037 = vtanh.f32 %v772_v28 }
 0xe3c   :  { %v1036_v27 = vpop.eup %1035 }
 0xe3d   :  { %779 = vrot.lane.b32.xlu1 %v1036_v27, %s1173_s13 }
 0xe3e   :  { %v1038_v29 = vpop.eup %1037 }
 0xe3f   :  { %v774_v30 = vadd.f32 1.0, %v1038_v29 }
 0xe41   :  { %v775_v32 = vmul.f32 0.5, %v774_v30 }
 0xe43   :  { %v777_v42 = vmul.f32 %v775_v32, %v695_v20 }
 0xeaf   :  { %v780_v37 = vpop.permute.xlu1 %779 }
 0xeb0   :  { %v782_v38 = vmul.f32 %v780_v37, %v775_v32 }
 0xeb2   :  { %784 = vrot.lane.b32.xlu2 %v782_v38, %s1174_s14 }
 0xedb   :  { %232 = vadd.xlane.f32.xlu2 %v231_v39 }
 0xee3   :  { %339 = vadd.xlane.f32.xlu2 %v338_v58 }
 0xf0c   :  { %v785_v43 = vpop.permute.xlu2 %784 }
 0xf0d   :  { %v1402_v44 = vadd.f32 %v785_v43, %v777_v42 }
 0xf0f   :  { %1039 = vtanh.f32 %v1402_v44 }
 0xf10   :  { %1041 = vrcp.f32 %v1175_v46 }
 0xf15   :  { %v1040_v45 = vpop.eup %1039 }
 0xf16   :  { %790 = vrot.lane.b32.xlu0 %v1040_v45, %s1173_s13  ;;  %v1042_v47 = vpop.eup %1041 }
 0xf17   :  { %v235_v48 = vmul.f32 32.0, %v1042_v47  ;;  %vm239_vm1 = vweird.f32 %v1042_v47 }
 0xf19   :  { %v236_v49 = vsub.f32 1.0, %v235_v48 }
 0xf1b   :  { %v237_v35 = vmul.f32 %v1042_v47, %v236_v49 }
 0xf1d   :  { %v238_v50 = vadd.f32 %v1042_v47, %v237_v35 }
 0xf1f   :  { %v1406_v51 = vsel %vm239_vm1, %v1042_v47, %v238_v50 }
 0xf4e   :  { %v233_v57 = vpop.xlane.xlu2 %232 }
 0xf4f   :  { %v241_v54 = vmul.f32 %v1406_v51, %v233_v57 }
 0xf51   :  { %v242_v60 = vsub.f32 %v1290_v33, %v241_v54 }
 0xf53   :  { %v243_v61 = vmul.f32 %v242_v60, %v242_v60 }
 0xf55   :  { %245 = vrot.lane.b32.xlu0 %v243_v61, %s1174_s14 }
 0xf56   :  { %v340_v12 = vpop.xlane.xlu2 %339 }
 0xf57   :  { %v341_v62 = vmul.f32 %v340_v12, %v1406_v51 }
 0xf59   :  { %v1413_v1 = vsub.f32 %v1324_v55, %v341_v62 }
 0xf5b   :  { %v343_v2 = vmul.f32 %v1413_v1, %v1413_v1 }
 0xf5d   :  { %345 = vrot.lane.b32.xlu2 %v343_v2, %s1174_s14 }
 0xf88   :  { %v791_v3 = vpop.permute.xlu0 %790 }
 0xf89   :  { %v1418_v4 = vmul.f32 %v791_v3, %v775_v32 }
 0xf8b   :  { %795 = vrot.lane.b32.xlu1 %v1418_v4, %s1174_s14 }
 0xfb7   :  { %v346_v46 = vpop.permute.xlu2 %345 }
 0xfb8   :  { %v348_v47 = vsel %vm75_vm0, %v346_v46, 0.0  ;;  %v706_v46 = vsel %vm75_vm0, %v1390_v23, 0.0 }
 0xfc7   :  { %v246_v33 = vpop.permute.xlu0 %245 }
 0xfc8   :  { %v248_v7 = vsel %vm75_vm0, %v246_v33, 0.0 }
 0xfc9   :  { %249 = vadd.xlane.f32.xlu0 %v248_v7 }
 0xfdd   :  { %369 = vrot.lane.b32.xlu0 %v1294_v34, %s1176_s3  ;;  %v997_v34 = vld [vmem:[%s1579_s4] ss:$0 sm:$0xff]  ;;  %s1177_s4 = smov [#allocation11]  }
 0xfde   :  { %s941_s5 = sshll.u32 %s1177_s4, 4  ;;  %s942_s5 = int_to_ptr.vmem [resolvable:$true] %s941_s5 }
 0xffd   :  { %v1425_v55 = vpop.permute.xlu1 %795 }
 0xffe   :  { %972 = vmatmul.msk.f32.vlgmr.msrb.gmra.mxu2 %vm75_vm0, %v1425_v55 }
0x1007   :  { %431 = vadd.xlane.f32.xlu0 %v430_v8 }
0x103c   :  { %v250_v14 = vpop.xlane.xlu0 %249 }
0x103d   :  { %v251_v59 = vmul.f32 %v250_v14, %v1406_v51 }
0x103f   :  { %v252_v16 = vadd.f32 1e-05, %v251_v59 }
0x1041   :  { %vm259_vm3 = vweird.f32 %v252_v16 }
0x104f   :  { %v370_v12 = vpop.permute.xlu0 %369 }
0x107a   :  { %v432_v8 = vpop.xlane.xlu0 %431 }
0x1081   :  { %v860_v10 = vpop.f32.mrf.mxu2 }
0x1082   :  { %v863_v11 = vadd.f32 %v860_v10, %v164_v9  ;;  %v433_v10 = vmul.f32 %v432_v8, %v1406_v51 }
0x1084   :  { %1043 = vtanh.f32 %v863_v11  ;;  %v864_v28 = vmul.f32 0.5, %v863_v11 }
0x1085   :  { %1045 = vrsqrt.f32 %v252_v16 }
0x1086   :  { %1047 = vtanh.f32 %v864_v28 }
0x108a   :  { %v1044_v13 = vpop.eup %1043 }
0x108b   :  { %871 = vrot.lane.b32.xlu1 %v1044_v13, %s1173_s13  ;;  %v1046_v19 = vpop.eup %1045  ;;  %v434_v13 = vsub.f32 %v1348_v17, %v433_v10 }
0x108c   :  { %v254_v20 = vmul.f32 %v1046_v19, %v252_v16  ;;  %vm260_vm2 = vweird.f32 %v1046_v19  ;;  %v1048_v38 = vpop.eup %1047 }
0x108d   :  { %vm261_vm4 = vmor %vm259_vm3, %vm260_vm2  ;;  %v866_v42 = vadd.f32 1.0, %v1048_v38  ;;  %v435_v14 = vmul.f32 %v434_v13, %v434_v13 }
0x108e   :  { %v255_v36 = vmul.f32 %v1046_v19, %v254_v20 }
0x108f   :  { %v867_v43 = vmul.f32 0.5, %v866_v42 }
0x1090   :  { %v256_v24 = vmul.f32 0.5, %v255_v36 }
0x1092   :  { %v257_v25 = vsub.f32 1.5, %v256_v24 }
0x1093   :  { %266 = vrot.lane.b32.xlu1 %v997_v34, %s1176_s3  ;;  %v869_v34 = vmul.f32 %v867_v43, %v1402_v44 }
0x1094   :  { %v258_v27 = vmul.f32 %v1046_v19, %v257_v25 }
0x109b   :  { %272 = vrot.lane.b32.xlu1 %v998_v18, %s1176_s3 }
0x10a3   :  { %278 = vrot.lane.b32.xlu1 %v1235_v6, %s1176_s3  ;;  %v262_v6 = vsel %vm261_vm4, %v1046_v19, %v258_v27 }
0x10a4   :  { %v263_v30 = vmul.f32 %v262_v6, %v242_v60 }
0x10fd   :  { %v872_v21 = vpop.permute.xlu1 %871 }
0x10fe   :  { %v874_v45 = vmul.f32 %v872_v21, %v867_v43 }
0x1105   :  { %v1445_v26 = vpop.permute.xlu1 %266 }
0x1106   :  { %v269_v32 = vmul.f32 %v1445_v26, %v263_v30 }
0x110d   :  { %v1447_v29 = vpop.permute.xlu1 %272 }
0x110e   :  { %v275_v37 = vadd.f32 %v1447_v29, %v269_v32 }
0x1115   :  { %v279_v39 = vpop.permute.xlu1 %278 }
0x1116   :  { %v281_v58 = vadd.f32 %v279_v39, %v275_v37 }
0x1118   :  { %283 = vrot.lane.b32.xlu1 %v281_v58, %s1174_s14 }
0x1120   :  { %876 = vrot.lane.b32.xlu1 %v874_v45, %s1174_s14  ;;  %v522_v45 = vsel %vm75_vm0, %v1364_v41, 0.0 }
0x114a   :  { %349 = vadd.xlane.f32.xlu1 %v348_v47  ;;  %v798_v47 = vsel %vm75_vm0, %v1425_v55, 0.0 }
0x1163   :  { %461 = vrot.lane.b32.xlu1 %v1328_v56, %s1176_s3 }
0x118a   :  { %v284_v48 = vpop.permute.xlu1 %283 }
0x118b   :  { %286 = vst.msk [vmem:[#allocation11] sm:$0xff] %vm75_vm0, %v284_v48 }
0x1192   :  { %v877_v49 = vpop.permute.xlu1 %876 }
0x1193   :  { %v1465_v18 = vadd.f32 %v877_v49, %v869_v34 }
0x11bd   :  { %v350_v35 = vpop.xlane.xlu1 %349 }
0x11be   :  { %v351_v50 = vmul.f32 %v350_v35, %v1406_v51 }
0x11c0   :  { %v352_v57 = vadd.f32 1e-05, %v351_v50 }
0x11c2   :  { %1049 = vrsqrt.f32 %v352_v57  ;;  %vm359_vm6 = vweird.f32 %v352_v57 }
0x11c3   :  { %1051 = vtanh.f32 %v1465_v18 }
0x11c8   :  { %v1050_v54 = vpop.eup %1049 }
0x11c9   :  { %v354_v60 = vmul.f32 %v1050_v54, %v352_v57  ;;  %vm360_vm5 = vweird.f32 %v1050_v54 }
0x11ca   :  { %vm361_vm7 = vmor %vm359_vm6, %vm360_vm5 }
0x11cb   :  { %v355_v61 = vmul.f32 %v1050_v54, %v354_v60 }
0x11cd   :  { %v356_v62 = vmul.f32 0.5, %v355_v61 }
0x11cf   :  { %v357_v2 = vsub.f32 1.5, %v356_v62 }
0x11d1   :  { %v358_v3 = vmul.f32 %v1050_v54, %v357_v2 }
0x11d3   :  { %v362_v56 = vsel %vm361_vm7, %v1050_v54, %v358_v3 }
0x11d4   :  { %v363_v33 = vmul.f32 %v362_v56, %v1413_v1  ;;  %v1052_v1 = vpop.eup %1051 }
0x11d5   :  { %v462_v58 = vpop.permute.xlu1 %461 }
0x11d6   :  { %v364_v7 = vmul.f32 %v363_v33, %v1445_v26 }
0x11d8   :  { %v365_v9 = vadd.f32 %v364_v7, %v1447_v29 }
0x11da   :  { %v372_v11 = vadd.f32 %v370_v12, %v365_v9 }
0x11dc   :  { %374 = vrot.lane.b32.xlu2 %v372_v11, %s1174_s14 }
0x11e4   :  { %437 = vrot.lane.b32.xlu2 %v435_v14, %s1174_s14 }
0x11ec   :  { %882 = vrot.lane.b32.xlu2 %v1052_v1, %s1173_s13 }
0x1236   :  { %v375_v59 = vpop.permute.xlu2 %374 }
0x1237   :  { %378 = vst.msk [vmem:[#allocation11 + $0x8] sm:$0xff] %vm75_vm0, %v375_v59 }
0x123e   :  { %v438_v16 = vpop.permute.xlu2 %437 }
0x123f   :  { %v440_v19 = vsel %vm75_vm0, %v438_v16, 0.0 }
0x1240   :  { %441 = vadd.xlane.f32.xlu2 %v440_v19 }
0x1246   :  { %v883_v17 = vpop.permute.xlu2 %882 }
0x1247   :  { %v1472_v20 = vmul.f32 %v883_v17, %v867_v43 }
0x1249   :  { %887 = vrot.lane.b32.xlu0 %v1472_v20, %s1174_s14 }
0x12b3   :  { %v442_v44 = vpop.xlane.xlu2 %441 }
0x12b4   :  { %v443_v36 = vmul.f32 %v442_v44, %v1406_v51 }
0x12b6   :  { %v444_v21 = vadd.f32 1e-05, %v443_v36 }
0x12b8   :  { %1053 = vrsqrt.f32 %v444_v21  ;;  %vm451_vm9 = vweird.f32 %v444_v21 }
0x12bb   :  { %v888_v24 = vpop.permute.xlu0 %887 }
0x12bc   :  { %931 = vst.msk [vmem:[#allocation3] sm:$0xff] %vm75_vm0, %v888_v24  ;;  %v890_v60 = vsel %vm75_vm0, %v888_v24, 0.0 }
0x12be   :  { %v1054_v25 = vpop.eup %1053 }
0x12bf   :  { %v446_v27 = vmul.f32 %v1054_v25, %v444_v21  ;;  %vm452_vm8 = vweird.f32 %v1054_v25 }
0x12c0   :  { %vm453_vm10 = vmor %vm451_vm9, %vm452_vm8 }
0x12c1   :  { %v447_v28 = vmul.f32 %v1054_v25, %v446_v27 }
0x12c3   :  { %v448_v6 = vmul.f32 0.5, %v447_v28 }
0x12c5   :  { %v449_v30 = vsub.f32 1.5, %v448_v6 }
0x12c7   :  { %v450_v32 = vmul.f32 %v1054_v25, %v449_v30 }
0x12c9   :  { %v454_v37 = vsel %vm453_vm10, %v1054_v25, %v450_v32 }
0x12ca   :  { %v455_v38 = vmul.f32 %v454_v37, %v434_v13 }
0x12cc   :  { %v456_v39 = vmul.f32 %v455_v38, %v1445_v26 }
0x12ce   :  { %v457_v42 = vadd.f32 %v456_v39, %v1447_v29 }
0x12d0   :  { %v464_v43 = vadd.f32 %v462_v58, %v457_v42 }
0x12d2   :  { %466 = vrot.lane.b32.xlu1 %v464_v43, %s1174_s14 }
0x12fc   :  { %523 = vadd.xlane.f32.xlu1 %v522_v45 }
0x1304   :  { %707 = vadd.xlane.f32.xlu1 %v706_v46 }
0x130c   :  { %799 = vadd.xlane.f32.xlu1 %v798_v47 }
0x1325   :  { %553 = vrot.lane.b32.xlu1 %v1344_v15, %s1176_s3  ;;  %v614_v15 = vsel %vm75_vm0, %v1377_v0, 0.0 }
0x132d   :  { %645 = vrot.lane.b32.xlu1 %v1233_v5, %s1176_s3 }
0x1344   :  { %v467_v48 = vpop.permute.xlu1 %466 }
0x1345   :  { %470 = vst.msk [vmem:[#allocation11 + $0x10] sm:$0xff] %vm75_vm0, %v467_v48 }
0x136f   :  { %v524_v49 = vpop.xlane.xlu1 %523 }
0x1370   :  { %v525_v41 = vmul.f32 %v524_v49, %v1406_v51 }
0x1372   :  { %v526_v35 = vsub.f32 %v1360_v40, %v525_v41 }
0x1374   :  { %v527_v23 = vmul.f32 %v526_v35, %v526_v35 }
0x1376   :  { %529 = vrot.lane.b32.xlu2 %v527_v23, %s1174_s14 }
0x1377   :  { %v708_v50 = vpop.xlane.xlu1 %707 }
0x1378   :  { %v709_v55 = vmul.f32 %v708_v50, %v1406_v51 }
0x137a   :  { %v1497_v57 = vsub.f32 %v1386_v22, %v709_v55 }
0x137c   :  { %v711_v5 = vmul.f32 %v1497_v57, %v1497_v57 }
0x137e   :  { %713 = vrot.lane.b32.xlu1 %v711_v5, %s1174_s14 }
0x137f   :  { %v800_v12 = vpop.xlane.xlu1 %799 }
0x1380   :  { %v801_v2 = vmul.f32 %v800_v12, %v1406_v51 }
0x1382   :  { %v1515_v3 = vsub.f32 %v1418_v4, %v801_v2 }
0x1384   :  { %v803_v56 = vmul.f32 %v1515_v3, %v1515_v3 }
0x1397   :  { %v554_v44 = vpop.permute.xlu1 %553 }
0x139f   :  { %615 = vadd.xlane.f32.xlu2 %v614_v15  ;;  %v646_v21 = vpop.permute.xlu1 %645 }
0x13d0   :  { %v530_v54 = vpop.permute.xlu2 %529 }
0x13d1   :  { %v532_v40 = vsel %vm75_vm0, %v530_v54, 0.0 }
0x13d2   :  { %533 = vadd.xlane.f32.xlu0 %v532_v40 }
0x13da   :  { %891 = vadd.xlane.f32.xlu0 %v890_v60 }
0x13f0   :  { %v714_v24 = vpop.permute.xlu1 %713 }
0x13f1   :  { %v716_v25 = vsel %vm75_vm0, %v714_v24, 0.0 }
0x1412   :  { %v616_v61 = vpop.xlane.xlu2 %615 }
0x1413   :  { %v617_v22 = vmul.f32 %v616_v61, %v1406_v51 }
0x1415   :  { %v1508_v62 = vsub.f32 %v1373_v63, %v617_v22 }
0x1417   :  { %v619_v0 = vmul.f32 %v1508_v62, %v1508_v62 }
0x1419   :  { %621 = vrot.lane.b32.xlu2 %v619_v0, %s1174_s14 }
0x1421   :  { %805 = vrot.lane.b32.xlu2 %v803_v56, %s1174_s14 }
0x1445   :  { %v534_v33 = vpop.xlane.xlu0 %533 }
0x1446   :  { %v535_v7 = vmul.f32 %v534_v33, %v1406_v51 }
0x1448   :  { %v536_v63 = vadd.f32 1e-05, %v535_v7 }
0x144a   :  { %1055 = vrsqrt.f32 %v536_v63  ;;  %vm543_vm12 = vweird.f32 %v536_v63 }
0x144d   :  { %v892_v8 = vpop.xlane.xlu0 %891 }
0x144e   :  { %v893_v9 = vmul.f32 %v892_v8, %v1406_v51 }
0x1450   :  { %v1056_v10 = vpop.eup %1055  ;;  %v1523_v11 = vsub.f32 %v1472_v20, %v893_v9 }
0x1451   :  { %v538_v13 = vmul.f32 %v1056_v10, %v536_v63  ;;  %vm544_vm11 = vweird.f32 %v1056_v10 }
0x1452   :  { %v895_v4 = vmul.f32 %v1523_v11, %v1523_v11  ;;  %vm545_vm13 = vmor %vm543_vm12, %vm544_vm11 }
0x1453   :  { %v539_v34 = vmul.f32 %v1056_v10, %v538_v13 }
0x1454   :  { %897 = vrot.lane.b32.xlu1 %v895_v4, %s1174_s14 }
0x1455   :  { %v540_v14 = vmul.f32 0.5, %v539_v34 }
0x1457   :  { %v541_v1 = vsub.f32 1.5, %v540_v14 }
0x1459   :  { %v542_v59 = vmul.f32 %v1056_v10, %v541_v1 }
0x145b   :  { %v546_v16 = vsel %vm545_vm13, %v1056_v10, %v542_v59 }
0x145c   :  { %v547_v19 = vmul.f32 %v546_v16, %v526_v35 }
0x145e   :  { %v548_v17 = vmul.f32 %v547_v19, %v1445_v26 }
0x1460   :  { %v549_v20 = vadd.f32 %v548_v17, %v1447_v29 }
0x1462   :  { %v556_v36 = vadd.f32 %v554_v44, %v549_v20 }
0x1464   :  { %558 = vrot.lane.b32.xlu0 %v556_v36, %s1174_s14 }
0x1473   :  { %v622_v27 = vpop.permute.xlu2 %621 }
0x1474   :  { %v624_v28 = vsel %vm75_vm0, %v622_v27, 0.0 }
0x147b   :  { %v806_v6 = vpop.permute.xlu2 %805 }
0x147c   :  { %v808_v30 = vsel %vm75_vm0, %v806_v6, 0.0 }
0x147e   :  { %717 = vadd.xlane.f32.xlu1 %v716_v25 }
0x148e   :  { %625 = vadd.xlane.f32.xlu0 %v624_v28 }
0x1496   :  { %809 = vadd.xlane.f32.xlu0 %v808_v30 }
0x1497   :  { %921 = vrot.lane.b32.xlu1 %v1318_v53, %s1176_s3 }
0x14aa   :  { %829 = vrot.lane.b32.xlu0 %v1312_v52, %s1176_s3 }
0x14c6   :  { %v898_v56 = vpop.permute.xlu1 %897 }
0x14c7   :  { %v900_v20 = vsel %vm75_vm0, %v898_v56, 0.0 }
0x14d6   :  { %v559_v32 = vpop.permute.xlu0 %558 }
0x14d7   :  { %562 = vst.msk [vmem:[#allocation11 + $0x18] sm:$0xff] %vm75_vm0, %v559_v32 }
0x14f1   :  { %v718_v33 = vpop.xlane.xlu1 %717 }
0x14f2   :  { %v719_v7 = vmul.f32 %v718_v33, %v1406_v51 }
0x14f4   :  { %v720_v63 = vadd.f32 1e-05, %v719_v7 }
0x14f6   :  { %vm727_vm6 = vweird.f32 %v720_v63 }
0x1501   :  { %v626_v37 = vpop.xlane.xlu0 %625 }
0x1502   :  { %v627_v38 = vmul.f32 %v626_v37, %v1406_v51 }
0x1504   :  { %v628_v39 = vadd.f32 1e-05, %v627_v38 }
0x1506   :  { %1057 = vrsqrt.f32 %v628_v39  ;;  %vm635_vm15 = vweird.f32 %v628_v39 }
0x1509   :  { %v810_v58 = vpop.xlane.xlu0 %809 }
0x150a   :  { %v811_v42 = vmul.f32 %v810_v58, %v1406_v51 }
0x150c   :  { %v1058_v43 = vpop.eup %1057  ;;  %v812_v45 = vadd.f32 1e-05, %v811_v42 }
0x150d   :  { %v630_v46 = vmul.f32 %v1058_v43, %v628_v39  ;;  %vm636_vm14 = vweird.f32 %v1058_v43  ;;  %v922_v39 = vpop.permute.xlu1 %921 }
0x150e   :  { %1059 = vrsqrt.f32 %v812_v45  ;;  %vm637_vm1 = vmor %vm635_vm15, %vm636_vm14  ;;  %vm819_vm3 = vweird.f32 %v812_v45 }
0x150f   :  { %v631_v47 = vmul.f32 %v1058_v43, %v630_v46  ;;  %1061 = vrsqrt.f32 %v720_v63 }
0x1511   :  { %v632_v53 = vmul.f32 0.5, %v631_v47 }
0x1513   :  { %v633_v48 = vsub.f32 1.5, %v632_v53 }
0x1514   :  { %v1060_v52 = vpop.eup %1059 }
0x1515   :  { %v634_v49 = vmul.f32 %v1058_v43, %v633_v48  ;;  %v814_v41 = vmul.f32 %v1060_v52, %v812_v45  ;;  %vm820_vm2 = vweird.f32 %v1060_v52  ;;  %v1062_v8 = vpop.eup %1061 }
0x1516   :  { %vm821_vm4 = vmor %vm819_vm3, %vm820_vm2  ;;  %v722_v9 = vmul.f32 %v1062_v8, %v720_v63  ;;  %vm728_vm5 = vweird.f32 %v1062_v8 }
0x1517   :  { %v638_v35 = vsel %vm637_vm1, %v1058_v43, %v634_v49  ;;  %v815_v23 = vmul.f32 %v1060_v52, %v814_v41  ;;  %vm729_vm7 = vmor %vm727_vm6, %vm728_vm5 }
0x1518   :  { %v639_v50 = vmul.f32 %v638_v35, %v1508_v62 }
0x1519   :  { %v816_v55 = vmul.f32 0.5, %v815_v23 }
0x151a   :  { %v640_v5 = vmul.f32 %v639_v50, %v1445_v26 }
0x151b   :  { %v817_v15 = vsub.f32 1.5, %v816_v55 }
0x151c   :  { %v641_v54 = vadd.f32 %v640_v5, %v1447_v29  ;;  %v830_v2 = vpop.permute.xlu0 %829 }
0x151d   :  { %v818_v40 = vmul.f32 %v1060_v52, %v817_v15 }
0x151e   :  { %v648_v60 = vadd.f32 %v646_v21, %v641_v54 }
0x151f   :  { %v822_v61 = vsel %vm821_vm4, %v1060_v52, %v818_v40 }
0x1520   :  { %650 = vrot.lane.b32.xlu2 %v648_v60, %s1174_s14  ;;  %v823_v22 = vmul.f32 %v822_v61, %v1515_v3  ;;  %v723_v3 = vmul.f32 %v1062_v8, %v722_v9 }
0x1522   :  { %v824_v12 = vmul.f32 %v823_v22, %v1445_v26  ;;  %v724_v10 = vmul.f32 0.5, %v723_v3 }
0x1524   :  { %v825_v62 = vadd.f32 %v824_v12, %v1447_v29  ;;  %v725_v13 = vsub.f32 1.5, %v724_v10 }
0x1526   :  { %v832_v0 = vadd.f32 %v830_v2, %v825_v62  ;;  %v726_v4 = vmul.f32 %v1062_v8, %v725_v13 }
0x1528   :  { %834 = vrot.lane.b32.xlu0 %v832_v0, %s1174_s14  ;;  %737 = vrot.lane.b32.xlu2 %v1282_v31, %s1176_s3  ;;  %v730_v34 = vsel %vm729_vm7, %v1062_v8, %v726_v4 }
0x1529   :  { %v731_v14 = vmul.f32 %v730_v34, %v1497_v57 }
0x152b   :  { %v732_v31 = vmul.f32 %v731_v14, %v1445_v26 }
0x152d   :  { %v733_v59 = vadd.f32 %v732_v31, %v1447_v29 }
0x157a   :  { %v651_v1 = vpop.permute.xlu2 %650 }
0x157b   :  { %654 = vst.msk [vmem:[#allocation11 + $0x20] sm:$0xff] %vm75_vm0, %v651_v1 }
0x1582   :  { %v738_v16 = vpop.permute.xlu2 %737 }
0x1583   :  { %v740_v19 = vadd.f32 %v738_v16, %v733_v59 }
0x1585   :  { %742 = vrot.lane.b32.xlu2 %v740_v19, %s1174_s14 }
0x159a   :  { %v835_v17 = vpop.permute.xlu0 %834 }
0x159b   :  { %838 = vst.msk [vmem:[#allocation11 + $0x30] sm:$0xff] %vm75_vm0, %v835_v17 }
0x15ae   :  { %901 = vadd.xlane.f32.xlu2 %v900_v20 }
0x15df   :  { %v743_v44 = vpop.permute.xlu2 %742 }
0x15e0   :  { %746 = vst.msk [vmem:[#allocation11 + $0x28] sm:$0xff] %vm75_vm0, %v743_v44 }
0x1621   :  { %v902_v57 = vpop.xlane.xlu2 %901 }
0x1622   :  { %v903_v36 = vmul.f32 %v902_v57, %v1406_v51 }
0x1624   :  { %v904_v21 = vadd.f32 1e-05, %v903_v36 }
0x1626   :  { %1063 = vrsqrt.f32 %v904_v21  ;;  %vm911_vm9 = vweird.f32 %v904_v21 }
0x162c   :  { %v1064_v24 = vpop.eup %1063 }
0x162d   :  { %v906_v25 = vmul.f32 %v1064_v24, %v904_v21  ;;  %vm912_vm8 = vweird.f32 %v1064_v24 }
0x162e   :  { %vm913_vm10 = vmor %vm911_vm9, %vm912_vm8 }
0x162f   :  { %v907_v27 = vmul.f32 %v1064_v24, %v906_v25 }
0x1631   :  { %v908_v28 = vmul.f32 0.5, %v907_v27 }
0x1633   :  { %v909_v6 = vsub.f32 1.5, %v908_v28 }
0x1635   :  { %v910_v30 = vmul.f32 %v1064_v24, %v909_v6 }
0x1637   :  { %v914_v32 = vsel %vm913_vm10, %v1064_v24, %v910_v30 }
0x1638   :  { %v915_v37 = vmul.f32 %v914_v32, %v1523_v11 }
0x163a   :  { %v916_v38 = vmul.f32 %v915_v37, %v1445_v26 }
0x163c   :  { %v917_v58 = vadd.f32 %v916_v38, %v1447_v29 }
0x163e   :  { %v924_v51 = vadd.f32 %v922_v39, %v917_v58 }
0x1640   :  { %926 = vrot.lane.b32.xlu0 %v924_v51, %s1174_s14 }
0x1648   :  { %933 = vrot.lane.b32.xlu0 %v1465_v18, %s1176_s3 }
0x16b2   :  { %v927_v11 = vpop.permute.xlu0 %926 }
0x16b3   :  { %930 = vst.msk [vmem:[#allocation11 + $0x38] sm:$0xff] %vm75_vm0, %v927_v11 }
0x16b4   :  { %949 = dma.vmem_to_hbm [thread:$0]  %s942_s5, 1024, %s944_s21, [#allocation7], %s1168_s29, %s1168_s29, %s1169_s30  }
0x16ba   :  { %v934_v26 = vpop.permute.xlu0 %933 }
0x16bb   :  { %936 = vst.msk [vmem:[#allocation4] sm:$0xff] %vm75_vm0, %v934_v26 }
0x16bc   :  { %1165 = dma.done.wait [#allocation7], 1024  }
0x16bd   :  { %1166 = vsyncadd [#allocation7], 4294966272 }
0x16be   :  { %954 = vsyncpa [#allocation6], 1 }
0x16bf   :  { %955 = vsyncpa [#allocation9], 1 }
0x16c0   :  { %956 = vsyncpa [#allocation7], 1 }

</bundles_post_ra>
